<compile_context>
chip_gen: v7x
topology: tpu7x:2x2x1
jax: 0.10.0
libtpu: 0.0.40
codegen_flags: <defaults>
</compile_context>

<pallas_src>
import functools

import jax
import jax.numpy as jnp
import numpy as np
from jax.experimental import pallas as pl
from jax.experimental.pallas import tpu as pltpu

NEG_SLOPE = 0.05  # nn.LeakyReLU(negative_slope=0.05) per the module spec


def _leaky(y):
    return jnp.where(y >= 0.0, y, NEG_SLOPE * y)


# ------------------------------ fused kernel ------------------------------- #

def fused_block_kernel(x_ref, t1_ref, b1_ref, t2_ref, b2_ref, tr_ref, br_ref,
                       o_ref, xpad_ref, opad_ref, *, cin):
    """Bn images per grid step, everything in VMEM.

    x_ref   : (Bn, H, W*Cin)                input rows, (w, ci) flattened on lanes
    t1_ref  : (3, (W+2)*Cin, W*Cin)         conv1 Toeplitz weights (BN folded in)
    b1_ref  : (1, W*Cin)                    conv1 bias tiled over w
    t2_ref  : (2, 2, (W+2)*Cin, 2*W*Cout)   conv2 upsample-folded Toeplitz [py, a]
    b2_ref  : (1, 2*W*Cout)
    tr_ref  : (2, 2, (W+2)*Cin, 2*W*Cout)   residual-branch Toeplitz [py, a]
    br_ref  : (1, 2*W*Cout)
    o_ref   : (Bn, 2, H, 2*W*Cout)          o[b, py, h, (2w+px)*Cout+co]
                                            == final[b, 2h+py, 2w+px, co]
    xpad_ref: (H+2, (W+2)*Cin) f32 scratch  zero-halo padded input rows
    opad_ref: (H+2, (W+2)*Cin) f32 scratch  zero-halo padded conv1 output rows
    """
    Bn, H, WC = x_ref.shape
    PWC = xpad_ref.shape[1]            # (W+2)*Cin
    NCOL = o_ref.shape[3]              # 2*W*Cout
    f32 = jnp.float32

    # Zero only the 1-pixel halo; interiors are fully overwritten below.
    zrow = jnp.zeros((1, PWC), f32)
    zcol = jnp.zeros((H + 2, cin), f32)
    for pad_ref in (xpad_ref, opad_ref):
        pad_ref[pl.ds(0, 1), :] = zrow
        pad_ref[pl.ds(H + 1, 1), :] = zrow
        pad_ref[:, pl.ds(0, cin)] = zcol
        pad_ref[:, pl.ds(PWC - cin, cin)] = zcol

    for b in range(Bn):
        # ---- conv1: 3x3 / pad 1 as three Toeplitz matmuls over the row window ----
        xpad_ref[pl.ds(1, H), pl.ds(cin, WC)] = x_ref[b].astype(f32)
        acc1 = jnp.zeros((H, WC), f32)
        for dy in range(3):
            acc1 = acc1 + jnp.dot(xpad_ref[pl.ds(dy, H), :], t1_ref[dy],
                                  preferred_element_type=f32)
        opad_ref[pl.ds(1, H), pl.ds(cin, WC)] = _leaky(acc1 + b1_ref[...])

        # ---- conv2 + residual: nearest-2x upsample folded into per-row-parity ----
        # ---- Toeplitz weights; output columns come out already W-interleaved ----
        for py in range(2):
            acc_c = jnp.zeros((H, NCOL), f32)
            acc_r = jnp.zeros((H, NCOL), f32)
            for a in range(2):
                acc_c = acc_c + jnp.dot(opad_ref[pl.ds(py + a, H), :], t2_ref[py, a],
                                        preferred_element_type=f32)
                acc_r = acc_r + jnp.dot(xpad_ref[pl.ds(py + a, H), :], tr_ref[py, a],
                                        preferred_element_type=f32)
            y = _leaky(acc_c + b2_ref[...]) + _leaky(acc_r + br_ref[...])
            o_ref[b, py] = y.astype(o_ref.dtype)       # single store per parity


# ------------------------- param folding (offline) ------------------------- #

# nearest-2x upsample followed by 3x3/pad-1 conv == for each output parity a 2-tap
# kernel over the *un-upsampled* padded input with pre-summed taps:
#   parity 0: tap 0 <- off 0 ; tap 1 <- off {1,2}    parity 1: tap 0 <- off {0,1} ; tap 1 <- off 2
_PARITY_MIX = np.array([[[1., 0., 0.], [0., 1., 1.]],
                        [[1., 1., 0.], [0., 0., 1.]]], dtype=np.float32)  # [parity, tap, off]


def build_conv1_toeplitz(w_hwio, width):
    """(3,3,Cin,Cout) -> (3, (W+2)*Cin, W*Cout) Toeplitz over the W axis.

    t[dy][wj*Cin+ci, w*Cout+co] = w[dy, wj-w, ci, co]  (zero unless 0 <= wj-w < 3)
    """
    kh, kw, cin, cout = w_hwio.shape
    sel = np.zeros((kw, width + 2, width), np.float32)          # [dx, wj, w]
    for dx in range(kw):
        for w in range(width):
            sel[dx, w + dx, w] = 1.0
    t = jnp.einsum("xjw,yxco->yjcwo", jnp.asarray(sel), w_hwio)
    return t.reshape(kh, (width + 2) * cin, width * cout)


def build_upsample_toeplitz(w_hwio, width):
    """Fold nearest-2x upsample + 3x3/pad-1 conv into per-row-parity Toeplitz weights.

    Returns (2, 2, (W+2)*Cin, 2*W*Cout) indexed [py, a]; multiplying padded source
    rows h+py+a (a in {0,1}) by t[py, a] and summing over a yields output rows 2h+py
    with columns already W-interleaved: (2w+px)*Cout + co.
    """
    kh, kw, cin, cout = w_hwio.shape
    sel = np.zeros((2, 2, width + 2, width), np.float32)        # [b, px, wj, w]
    for b in range(2):
        for px in range(2):
            for w in range(width):
                sel[b, px, w + px + b, w] = 1.0
    mix = jnp.asarray(_PARITY_MIX)                              # [parity, tap, off]
    t = jnp.einsum("pay,qbx,bqjw,yxco->pajcwqo",
                   mix, mix, jnp.asarray(sel), w_hwio)
    return t.reshape(2, 2, (width + 2) * cin, 2 * width * cout)


def make_conv_norm_relu_params(key, cin, cout):
    """Deterministic init; eval-mode BN + conv bias folded into (scaled w, bias)."""
    kw_, kb, kg, kbe, km, kv = jax.random.split(key, 6)
    w_oihw = 0.1 * jax.random.normal(kw_, (cout, cin, 3, 3), jnp.float32)  # torch layout
    conv_b = 0.1 * jax.random.normal(kb, (cout,), jnp.float32)
    gamma = 1.0 + 0.1 * jax.random.normal(kg, (cout,), jnp.float32)
    beta = 0.1 * jax.random.normal(kbe, (cout,), jnp.float32)
    r_mean = 0.1 * jax.random.normal(km, (cout,), jnp.float32)
    r_var = 1.0 + 0.1 * jnp.abs(jax.random.normal(kv, (cout,), jnp.float32))
    eps = 1e-5
    scale = gamma / jnp.sqrt(r_var + eps)
    bias = beta + (conv_b - r_mean) * scale
    w_hwio = jnp.transpose(w_oihw, (2, 3, 1, 0)) * scale[None, None, None, :]  # fold BN scale
    return w_hwio, bias


# --------------------------------- wrapper --------------------------------- #

def residual_upsample_block(x_nchw, p_conv1, p_conv2, p_residual, images_per_step=1):
    """Forward of ResidualUpsampleBlock with stride != 1 (upsample path). NCHW in/out."""
    N, Cin, H, W = x_nchw.shape
    w1, b1 = p_conv1
    w2, b2 = p_conv2
    wr, br = p_residual
    Cout = w2.shape[3]
    assert N % images_per_step == 0
    Bn = images_per_step
    NCOL = 2 * W * Cout

    # Offline weight prep (BN already folded): Toeplitz-over-W matrices + lane-tiled
    # biases.  Constant-folded under jit; resident in VMEM via constant index_maps.
    t1 = build_conv1_toeplitz(w1, W)
    t2 = build_upsample_toeplitz(w2, W)
    tr = build_upsample_toeplitz(wr, W)
    b1t = jnp.tile(b1.reshape(-1), W).reshape(1, W * Cin)
    b2t = jnp.tile(b2.reshape(-1), 2 * W).reshape(1, NCOL)
    brt = jnp.tile(br.reshape(-1), 2 * W).reshape(1, NCOL)

    x = jnp.transpose(x_nchw, (0, 2, 3, 1)).reshape(N, H, W * Cin)   # rows, (w,ci) on lanes

    out_pp = pl.pallas_call(
        functools.partial(fused_block_kernel, cin=Cin),
        out_shape=jax.ShapeDtypeStruct((N, 2, H, NCOL), x.dtype),
        grid=(N // Bn,),
        in_specs=[
            pl.BlockSpec((Bn, H, W * Cin), lambda n: (n, 0, 0)),
            pl.BlockSpec((3, (W + 2) * Cin, W * Cin), lambda n: (0, 0, 0)),
            pl.BlockSpec((1, W * Cin), lambda n: (0, 0)),
            pl.BlockSpec((2, 2, (W + 2) * Cin, NCOL), lambda n: (0, 0, 0, 0)),
            pl.BlockSpec((1, NCOL), lambda n: (0, 0)),
            pl.BlockSpec((2, 2, (W + 2) * Cin, NCOL), lambda n: (0, 0, 0, 0)),
            pl.BlockSpec((1, NCOL), lambda n: (0, 0)),
        ],
        out_specs=pl.BlockSpec((Bn, 2, H, NCOL), lambda n: (n, 0, 0, 0)),
        scratch_shapes=[pltpu.VMEM((H + 2, (W + 2) * Cin), jnp.float32),
                        pltpu.VMEM((H + 2, (W + 2) * Cin), jnp.float32)],
        compiler_params=pltpu.CompilerParams(
            dimension_semantics=("parallel",),           # N=2 steps -> both TCs on v7x
            vmem_limit_bytes=32 * 1024 * 1024),
    )(x, t1, b1t, t2, b2t, tr, brt)

    # Only the row (h, py) interleave + NHWC->NCHW is left for XLA; the W parity is
    # already interleaved inside the kernel's lane-dense output.
    out = out_pp.reshape(N, 2, H, 2 * W, Cout)                     # [n, py, h, 2w+px, co]
    out = jnp.transpose(out, (0, 4, 2, 1, 3)).reshape(N, Cout, 2 * H, 2 * W)
    return out


# ------------------------------ pure-JAX ref -------------------------------- #

def _up2(x_nhwc):
    x = jnp.repeat(x_nhwc, 2, axis=1)
    return jnp.repeat(x, 2, axis=2)


def _ref_cnr(x_nhwc, w_hwio, bias):
    y = jax.lax.conv_general_dilated(
        x_nhwc, w_hwio, window_strides=(1, 1), padding="SAME",
        dimension_numbers=("NHWC", "HWIO", "NHWC"),
        precision=jax.lax.Precision.HIGHEST)
    y = y + bias.reshape(1, 1, 1, -1)
    return jnp.where(y >= 0.0, y, NEG_SLOPE * y)


def _ref_block(x_nchw, p1, p2, pr):
    x = jnp.transpose(x_nchw, (0, 2, 3, 1))
    out = _ref_cnr(x, *p1)
    out = _ref_cnr(_up2(out), *p2)
    res = _ref_cnr(_up2(x), *pr)
    return jnp.transpose(out + res, (0, 3, 1, 2))


# ---------------------------------- main ------------------------------------ #

if __name__ == "__main__":
    key = jax.random.PRNGKey(0)
    kx, k1, k2, k3 = jax.random.split(key, 4)

    N, Cin, Cout, H, W = 2, 4, 8, 16, 16          # ResidualUpsampleBlock(4, 8, stride=2)
    x = jax.random.normal(kx, (N, Cin, H, W), jnp.float32)

    p_conv1 = make_conv_norm_relu_params(k1, Cin, Cin)    # ConvNormRelu(Cin, Cin)
    p_conv2 = make_conv_norm_relu_params(k2, Cin, Cout)   # ConvNormRelu(Cin, Cout, upsample)
    p_resid = make_conv_norm_relu_params(k3, Cin, Cout)   # ConvNormRelu(Cin, Cout, upsample)

    fwd = jax.jit(functools.partial(residual_upsample_block,
                                    p_conv1=p_conv1, p_conv2=p_conv2, p_residual=p_resid))
    out = jax.block_until_ready(fwd(x))
    assert out.shape == (N, Cout, 2 * H, 2 * W), out.shape

    ref = jax.block_until_ready(_ref_block(x, p_conv1, p_conv2, p_resid))
    np.testing.assert_allclose(np.asarray(out), np.asarray(ref), rtol=2e-3, atol=2e-3)

    print("KERNEL_OK")
</pallas_src>

<mosaic_0001>
module attributes {stable_mosaic.version = 11 : i64} {
  func.func @fused_block_kernel(%arg0: i32, %arg1: memref<1x16x64xf32, #tpu.memory_space<vmem>>, %arg2: memref<3x72x64xf32, #tpu.memory_space<vmem>>, %arg3: memref<1x64xf32, #tpu.memory_space<vmem>>, %arg4: memref<2x2x72x256xf32, #tpu.memory_space<vmem>>, %arg5: memref<1x256xf32, #tpu.memory_space<vmem>>, %arg6: memref<2x2x72x256xf32, #tpu.memory_space<vmem>>, %arg7: memref<1x256xf32, #tpu.memory_space<vmem>>, %arg8: memref<1x2x16x256xf32, #tpu.memory_space<vmem>>, %arg9: memref<18x72xf32, #tpu.memory_space<vmem>>, %arg10: memref<18x72xf32, #tpu.memory_space<vmem>>) attributes {dimension_semantics = [#tpu.dimension_semantics<parallel>], iteration_bounds = array<i64: 2>, scalar_prefetch = 0 : i64, scratch_operands = 2 : i64, tpu.core_type = #tpu.core_type<tc>, window_params = [{transform_indices = @transform_0, window_bounds = array<i64: 1, 16, 64>}, {pipeline_mode = #tpu.pipeline_mode<synchronous>, transform_indices = @transform_1, window_bounds = array<i64: 3, 72, 64>}, {pipeline_mode = #tpu.pipeline_mode<synchronous>, transform_indices = @transform_2, window_bounds = array<i64: 1, 64>}, {pipeline_mode = #tpu.pipeline_mode<synchronous>, transform_indices = @transform_3, window_bounds = array<i64: 2, 2, 72, 256>}, {pipeline_mode = #tpu.pipeline_mode<synchronous>, transform_indices = @transform_4, window_bounds = array<i64: 1, 256>}, {pipeline_mode = #tpu.pipeline_mode<synchronous>, transform_indices = @transform_5, window_bounds = array<i64: 2, 2, 72, 256>}, {pipeline_mode = #tpu.pipeline_mode<synchronous>, transform_indices = @transform_6, window_bounds = array<i64: 1, 256>}, {transform_indices = @transform_7, window_bounds = array<i64: 1, 2, 16, 256>}]} {
    %cst = arith.constant 0.000000e+00 : f32
    %0 = vector.broadcast %cst : f32 to vector<1x72xf32>
    %cst_0 = arith.constant 0.000000e+00 : f32
    %1 = vector.broadcast %cst_0 : f32 to vector<18x4xf32>
    %c0 = arith.constant 0 : index
    %c0_1 = arith.constant 0 : index
    %2 = vector.load %arg9[%c0, %c0_1] : memref<18x72xf32, #tpu.memory_space<vmem>>, vector<1x72xf32>
    tpu.vector_store %arg9[%c0, %c0_1], %0 {strides = array<i32>} : memref<18x72xf32, #tpu.memory_space<vmem>>, vector<1x72xf32>,
    %c17 = arith.constant 17 : index
    %c0_2 = arith.constant 0 : index
    %3 = vector.load %arg9[%c17, %c0_2] : memref<18x72xf32, #tpu.memory_space<vmem>>, vector<1x72xf32>
    tpu.vector_store %arg9[%c17, %c0_2], %0 {strides = array<i32>} : memref<18x72xf32, #tpu.memory_space<vmem>>, vector<1x72xf32>,
    %c0_3 = arith.constant 0 : index
    %c0_4 = arith.constant 0 : index
    %4 = vector.load %arg9[%c0_3, %c0_4] : memref<18x72xf32, #tpu.memory_space<vmem>>, vector<18x4xf32>
    tpu.vector_store %arg9[%c0_3, %c0_4], %1 {strides = array<i32>} : memref<18x72xf32, #tpu.memory_space<vmem>>, vector<18x4xf32>,
    %c0_5 = arith.constant 0 : index
    %c68 = arith.constant 68 : index
    %5 = vector.load %arg9[%c0_5, %c68] : memref<18x72xf32, #tpu.memory_space<vmem>>, vector<18x4xf32>
    tpu.vector_store %arg9[%c0_5, %c68], %1 {strides = array<i32>} : memref<18x72xf32, #tpu.memory_space<vmem>>, vector<18x4xf32>,
    %c0_6 = arith.constant 0 : index
    %c0_7 = arith.constant 0 : index
    %6 = vector.load %arg10[%c0_6, %c0_7] : memref<18x72xf32, #tpu.memory_space<vmem>>, vector<1x72xf32>
    tpu.vector_store %arg10[%c0_6, %c0_7], %0 {strides = array<i32>} : memref<18x72xf32, #tpu.memory_space<vmem>>, vector<1x72xf32>,
    %c17_8 = arith.constant 17 : index
    %c0_9 = arith.constant 0 : index
    %7 = vector.load %arg10[%c17_8, %c0_9] : memref<18x72xf32, #tpu.memory_space<vmem>>, vector<1x72xf32>
    tpu.vector_store %arg10[%c17_8, %c0_9], %0 {strides = array<i32>} : memref<18x72xf32, #tpu.memory_space<vmem>>, vector<1x72xf32>,
    %c0_10 = arith.constant 0 : index
    %c0_11 = arith.constant 0 : index
    %8 = vector.load %arg10[%c0_10, %c0_11] : memref<18x72xf32, #tpu.memory_space<vmem>>, vector<18x4xf32>
    tpu.vector_store %arg10[%c0_10, %c0_11], %1 {strides = array<i32>} : memref<18x72xf32, #tpu.memory_space<vmem>>, vector<18x4xf32>,
    %c0_12 = arith.constant 0 : index
    %c68_13 = arith.constant 68 : index
    %9 = vector.load %arg10[%c0_12, %c68_13] : memref<18x72xf32, #tpu.memory_space<vmem>>, vector<18x4xf32>
    tpu.vector_store %arg10[%c0_12, %c68_13], %1 {strides = array<i32>} : memref<18x72xf32, #tpu.memory_space<vmem>>, vector<18x4xf32>,
    %c0_14 = arith.constant 0 : index
    %c0_15 = arith.constant 0 : index
    %c0_16 = arith.constant 0 : index
    %10 = vector.load %arg1[%c0_14, %c0_15, %c0_16] : memref<1x16x64xf32, #tpu.memory_space<vmem>>, vector<1x16x64xf32>
    %11 = vector.shape_cast %10 : vector<1x16x64xf32> to vector<16x64xf32>
    %c1 = arith.constant 1 : index
    %c4 = arith.constant 4 : index
    %12 = vector.load %arg9[%c1, %c4] : memref<18x72xf32, #tpu.memory_space<vmem>>, vector<16x64xf32>
    tpu.vector_store %arg9[%c1, %c4], %11 {strides = array<i32>} : memref<18x72xf32, #tpu.memory_space<vmem>>, vector<16x64xf32>,
    %cst_17 = arith.constant 0.000000e+00 : f32
    %13 = vector.broadcast %cst_17 : f32 to vector<16x64xf32>
    %c0_18 = arith.constant 0 : index
    %c0_19 = arith.constant 0 : index
    %14 = vector.load %arg9[%c0_18, %c0_19] : memref<18x72xf32, #tpu.memory_space<vmem>>, vector<16x72xf32>
    %c0_20 = arith.constant 0 : index
    %c0_21 = arith.constant 0 : index
    %c0_22 = arith.constant 0 : index
    %15 = vector.load %arg2[%c0_20, %c0_21, %c0_22] : memref<3x72x64xf32, #tpu.memory_space<vmem>>, vector<1x72x64xf32>
    %16 = vector.shape_cast %15 : vector<1x72x64xf32> to vector<72x64xf32>
    %cst_23 = arith.constant dense<0.000000e+00> : vector<16x64xf32>
    %17 = tpu.matmul %14, %16, %cst_23 {dimension_numbers = #tpu.dot_dimension_numbers<[1], [0], [0], [1], [0, 0, 1, 1], [], []>} : vector<16x72xf32>, vector<72x64xf32>, vector<16x64xf32> -> vector<16x64xf32>
    %18 = arith.addf %13, %17 : vector<16x64xf32>
    %c1_24 = arith.constant 1 : index
    %c0_25 = arith.constant 0 : index
    %19 = vector.load %arg9[%c1_24, %c0_25] : memref<18x72xf32, #tpu.memory_space<vmem>>, vector<16x72xf32>
    %c1_26 = arith.constant 1 : index
    %c0_27 = arith.constant 0 : index
    %c0_28 = arith.constant 0 : index
    %20 = vector.load %arg2[%c1_26, %c0_27, %c0_28] : memref<3x72x64xf32, #tpu.memory_space<vmem>>, vector<1x72x64xf32>
    %21 = vector.shape_cast %20 : vector<1x72x64xf32> to vector<72x64xf32>
    %cst_29 = arith.constant dense<0.000000e+00> : vector<16x64xf32>
    %22 = tpu.matmul %19, %21, %cst_29 {dimension_numbers = #tpu.dot_dimension_numbers<[1], [0], [0], [1], [0, 0, 1, 1], [], []>} : vector<16x72xf32>, vector<72x64xf32>, vector<16x64xf32> -> vector<16x64xf32>
    %23 = arith.addf %18, %22 : vector<16x64xf32>
    %c2 = arith.constant 2 : index
    %c0_30 = arith.constant 0 : index
    %24 = vector.load %arg9[%c2, %c0_30] : memref<18x72xf32, #tpu.memory_space<vmem>>, vector<16x72xf32>
    %c2_31 = arith.constant 2 : index
    %c0_32 = arith.constant 0 : index
    %c0_33 = arith.constant 0 : index
    %25 = vector.load %arg2[%c2_31, %c0_32, %c0_33] : memref<3x72x64xf32, #tpu.memory_space<vmem>>, vector<1x72x64xf32>
    %26 = vector.shape_cast %25 : vector<1x72x64xf32> to vector<72x64xf32>
    %cst_34 = arith.constant dense<0.000000e+00> : vector<16x64xf32>
    %27 = tpu.matmul %24, %26, %cst_34 {dimension_numbers = #tpu.dot_dimension_numbers<[1], [0], [0], [1], [0, 0, 1, 1], [], []>} : vector<16x72xf32>, vector<72x64xf32>, vector<16x64xf32> -> vector<16x64xf32>
    %28 = arith.addf %23, %27 : vector<16x64xf32>
    %c0_35 = arith.constant 0 : index
    %c0_36 = arith.constant 0 : index
    %29 = vector.load %arg3[%c0_35, %c0_36] : memref<1x64xf32, #tpu.memory_space<vmem>>, vector<1x64xf32>
    %30 = vector.broadcast %29 : vector<1x64xf32> to vector<16x64xf32>
    %31 = arith.addf %28, %30 : vector<16x64xf32>
    %cst_37 = arith.constant 0.000000e+00 : f32
    %32 = vector.broadcast %cst_37 : f32 to vector<16x64xf32>
    %33 = arith.cmpf oge, %31, %32 : vector<16x64xf32>
    %cst_38 = arith.constant 5.000000e-02 : f32
    %34 = vector.broadcast %cst_38 : f32 to vector<16x64xf32>
    %35 = arith.mulf %34, %31 : vector<16x64xf32>
    %36 = arith.select %33, %31, %35 : vector<16x64xi1>, vector<16x64xf32>
    %c1_39 = arith.constant 1 : index
    %c4_40 = arith.constant 4 : index
    %37 = vector.load %arg10[%c1_39, %c4_40] : memref<18x72xf32, #tpu.memory_space<vmem>>, vector<16x64xf32>
    tpu.vector_store %arg10[%c1_39, %c4_40], %36 {strides = array<i32>} : memref<18x72xf32, #tpu.memory_space<vmem>>, vector<16x64xf32>,
    %cst_41 = arith.constant 0.000000e+00 : f32
    %38 = vector.broadcast %cst_41 : f32 to vector<16x256xf32>
    %cst_42 = arith.constant 0.000000e+00 : f32
    %39 = vector.broadcast %cst_42 : f32 to vector<16x256xf32>
    %c0_43 = arith.constant 0 : index
    %c0_44 = arith.constant 0 : index
    %40 = vector.load %arg10[%c0_43, %c0_44] : memref<18x72xf32, #tpu.memory_space<vmem>>, vector<16x72xf32>
    %c0_45 = arith.constant 0 : index
    %c0_46 = arith.constant 0 : index
    %c0_47 = arith.constant 0 : index
    %c0_48 = arith.constant 0 : index
    %41 = vector.load %arg4[%c0_45, %c0_46, %c0_47, %c0_48] : memref<2x2x72x256xf32, #tpu.memory_space<vmem>>, vector<1x1x72x256xf32>
    %42 = vector.shape_cast %41 : vector<1x1x72x256xf32> to vector<72x256xf32>
    %cst_49 = arith.constant dense<0.000000e+00> : vector<16x256xf32>
    %43 = tpu.matmul %40, %42, %cst_49 {dimension_numbers = #tpu.dot_dimension_numbers<[1], [0], [0], [1], [0, 0, 1, 1], [], []>} : vector<16x72xf32>, vector<72x256xf32>, vector<16x256xf32> -> vector<16x256xf32>
    %44 = arith.addf %38, %43 : vector<16x256xf32>
    %c0_50 = arith.constant 0 : index
    %c0_51 = arith.constant 0 : index
    %45 = vector.load %arg9[%c0_50, %c0_51] : memref<18x72xf32, #tpu.memory_space<vmem>>, vector<16x72xf32>
    %c0_52 = arith.constant 0 : index
    %c0_53 = arith.constant 0 : index
    %c0_54 = arith.constant 0 : index
    %c0_55 = arith.constant 0 : index
    %46 = vector.load %arg6[%c0_52, %c0_53, %c0_54, %c0_55] : memref<2x2x72x256xf32, #tpu.memory_space<vmem>>, vector<1x1x72x256xf32>
    %47 = vector.shape_cast %46 : vector<1x1x72x256xf32> to vector<72x256xf32>
    %cst_56 = arith.constant dense<0.000000e+00> : vector<16x256xf32>
    %48 = tpu.matmul %45, %47, %cst_56 {dimension_numbers = #tpu.dot_dimension_numbers<[1], [0], [0], [1], [0, 0, 1, 1], [], []>} : vector<16x72xf32>, vector<72x256xf32>, vector<16x256xf32> -> vector<16x256xf32>
    %49 = arith.addf %39, %48 : vector<16x256xf32>
    %c1_57 = arith.constant 1 : index
    %c0_58 = arith.constant 0 : index
    %50 = vector.load %arg10[%c1_57, %c0_58] : memref<18x72xf32, #tpu.memory_space<vmem>>, vector<16x72xf32>
    %c0_59 = arith.constant 0 : index
    %c1_60 = arith.constant 1 : index
    %c0_61 = arith.constant 0 : index
    %c0_62 = arith.constant 0 : index
    %51 = vector.load %arg4[%c0_59, %c1_60, %c0_61, %c0_62] : memref<2x2x72x256xf32, #tpu.memory_space<vmem>>, vector<1x1x72x256xf32>
    %52 = vector.shape_cast %51 : vector<1x1x72x256xf32> to vector<72x256xf32>
    %cst_63 = arith.constant dense<0.000000e+00> : vector<16x256xf32>
    %53 = tpu.matmul %50, %52, %cst_63 {dimension_numbers = #tpu.dot_dimension_numbers<[1], [0], [0], [1], [0, 0, 1, 1], [], []>} : vector<16x72xf32>, vector<72x256xf32>, vector<16x256xf32> -> vector<16x256xf32>
    %54 = arith.addf %44, %53 : vector<16x256xf32>
    %c1_64 = arith.constant 1 : index
    %c0_65 = arith.constant 0 : index
    %55 = vector.load %arg9[%c1_64, %c0_65] : memref<18x72xf32, #tpu.memory_space<vmem>>, vector<16x72xf32>
    %c0_66 = arith.constant 0 : index
    %c1_67 = arith.constant 1 : index
    %c0_68 = arith.constant 0 : index
    %c0_69 = arith.constant 0 : index
    %56 = vector.load %arg6[%c0_66, %c1_67, %c0_68, %c0_69] : memref<2x2x72x256xf32, #tpu.memory_space<vmem>>, vector<1x1x72x256xf32>
    %57 = vector.shape_cast %56 : vector<1x1x72x256xf32> to vector<72x256xf32>
    %cst_70 = arith.constant dense<0.000000e+00> : vector<16x256xf32>
    %58 = tpu.matmul %55, %57, %cst_70 {dimension_numbers = #tpu.dot_dimension_numbers<[1], [0], [0], [1], [0, 0, 1, 1], [], []>} : vector<16x72xf32>, vector<72x256xf32>, vector<16x256xf32> -> vector<16x256xf32>
    %59 = arith.addf %49, %58 : vector<16x256xf32>
    %c0_71 = arith.constant 0 : index
    %c0_72 = arith.constant 0 : index
    %60 = vector.load %arg5[%c0_71, %c0_72] : memref<1x256xf32, #tpu.memory_space<vmem>>, vector<1x256xf32>
    %61 = vector.broadcast %60 : vector<1x256xf32> to vector<16x256xf32>
    %62 = arith.addf %54, %61 : vector<16x256xf32>
    %cst_73 = arith.constant 0.000000e+00 : f32
    %63 = vector.broadcast %cst_73 : f32 to vector<16x256xf32>
    %64 = arith.cmpf oge, %62, %63 : vector<16x256xf32>
    %cst_74 = arith.constant 5.000000e-02 : f32
    %65 = vector.broadcast %cst_74 : f32 to vector<16x256xf32>
    %66 = arith.mulf %65, %62 : vector<16x256xf32>
    %67 = arith.select %64, %62, %66 : vector<16x256xi1>, vector<16x256xf32>
    %c0_75 = arith.constant 0 : index
    %c0_76 = arith.constant 0 : index
    %68 = vector.load %arg7[%c0_75, %c0_76] : memref<1x256xf32, #tpu.memory_space<vmem>>, vector<1x256xf32>
    %69 = vector.broadcast %68 : vector<1x256xf32> to vector<16x256xf32>
    %70 = arith.addf %59, %69 : vector<16x256xf32>
    %cst_77 = arith.constant 0.000000e+00 : f32
    %71 = vector.broadcast %cst_77 : f32 to vector<16x256xf32>
    %72 = arith.cmpf oge, %70, %71 : vector<16x256xf32>
    %cst_78 = arith.constant 5.000000e-02 : f32
    %73 = vector.broadcast %cst_78 : f32 to vector<16x256xf32>
    %74 = arith.mulf %73, %70 : vector<16x256xf32>
    %75 = arith.select %72, %70, %74 : vector<16x256xi1>, vector<16x256xf32>
    %76 = arith.addf %67, %75 : vector<16x256xf32>
    %c0_79 = arith.constant 0 : index
    %c0_80 = arith.constant 0 : index
    %c0_81 = arith.constant 0 : index
    %c0_82 = arith.constant 0 : index
    %77 = vector.load %arg8[%c0_79, %c0_80, %c0_81, %c0_82] : memref<1x2x16x256xf32, #tpu.memory_space<vmem>>, vector<1x1x16x256xf32>
    %78 = vector.shape_cast %77 : vector<1x1x16x256xf32> to vector<16x256xf32>
    %79 = vector.shape_cast %76 : vector<16x256xf32> to vector<1x1x16x256xf32>
    tpu.vector_store %arg8[%c0_79, %c0_80, %c0_81, %c0_82], %79 {strides = array<i32>} : memref<1x2x16x256xf32, #tpu.memory_space<vmem>>, vector<1x1x16x256xf32>,
    %cst_83 = arith.constant 0.000000e+00 : f32
    %80 = vector.broadcast %cst_83 : f32 to vector<16x256xf32>
    %cst_84 = arith.constant 0.000000e+00 : f32
    %81 = vector.broadcast %cst_84 : f32 to vector<16x256xf32>
    %c1_85 = arith.constant 1 : index
    %c0_86 = arith.constant 0 : index
    %82 = vector.load %arg10[%c1_85, %c0_86] : memref<18x72xf32, #tpu.memory_space<vmem>>, vector<16x72xf32>
    %c1_87 = arith.constant 1 : index
    %c0_88 = arith.constant 0 : index
    %c0_89 = arith.constant 0 : index
    %c0_90 = arith.constant 0 : index
    %83 = vector.load %arg4[%c1_87, %c0_88, %c0_89, %c0_90] : memref<2x2x72x256xf32, #tpu.memory_space<vmem>>, vector<1x1x72x256xf32>
    %84 = vector.shape_cast %83 : vector<1x1x72x256xf32> to vector<72x256xf32>
    %cst_91 = arith.constant dense<0.000000e+00> : vector<16x256xf32>
    %85 = tpu.matmul %82, %84, %cst_91 {dimension_numbers = #tpu.dot_dimension_numbers<[1], [0], [0], [1], [0, 0, 1, 1], [], []>} : vector<16x72xf32>, vector<72x256xf32>, vector<16x256xf32> -> vector<16x256xf32>
    %86 = arith.addf %80, %85 : vector<16x256xf32>
    %c1_92 = arith.constant 1 : index
    %c0_93 = arith.constant 0 : index
    %87 = vector.load %arg9[%c1_92, %c0_93] : memref<18x72xf32, #tpu.memory_space<vmem>>, vector<16x72xf32>
    %c1_94 = arith.constant 1 : index
    %c0_95 = arith.constant 0 : index
    %c0_96 = arith.constant 0 : index
    %c0_97 = arith.constant 0 : index
    %88 = vector.load %arg6[%c1_94, %c0_95, %c0_96, %c0_97] : memref<2x2x72x256xf32, #tpu.memory_space<vmem>>, vector<1x1x72x256xf32>
    %89 = vector.shape_cast %88 : vector<1x1x72x256xf32> to vector<72x256xf32>
    %cst_98 = arith.constant dense<0.000000e+00> : vector<16x256xf32>
    %90 = tpu.matmul %87, %89, %cst_98 {dimension_numbers = #tpu.dot_dimension_numbers<[1], [0], [0], [1], [0, 0, 1, 1], [], []>} : vector<16x72xf32>, vector<72x256xf32>, vector<16x256xf32> -> vector<16x256xf32>
    %91 = arith.addf %81, %90 : vector<16x256xf32>
    %c2_99 = arith.constant 2 : index
    %c0_100 = arith.constant 0 : index
    %92 = vector.load %arg10[%c2_99, %c0_100] : memref<18x72xf32, #tpu.memory_space<vmem>>, vector<16x72xf32>
    %c1_101 = arith.constant 1 : index
    %c1_102 = arith.constant 1 : index
    %c0_103 = arith.constant 0 : index
    %c0_104 = arith.constant 0 : index
    %93 = vector.load %arg4[%c1_101, %c1_102, %c0_103, %c0_104] : memref<2x2x72x256xf32, #tpu.memory_space<vmem>>, vector<1x1x72x256xf32>
    %94 = vector.shape_cast %93 : vector<1x1x72x256xf32> to vector<72x256xf32>
    %cst_105 = arith.constant dense<0.000000e+00> : vector<16x256xf32>
    %95 = tpu.matmul %92, %94, %cst_105 {dimension_numbers = #tpu.dot_dimension_numbers<[1], [0], [0], [1], [0, 0, 1, 1], [], []>} : vector<16x72xf32>, vector<72x256xf32>, vector<16x256xf32> -> vector<16x256xf32>
    %96 = arith.addf %86, %95 : vector<16x256xf32>
    %c2_106 = arith.constant 2 : index
    %c0_107 = arith.constant 0 : index
    %97 = vector.load %arg9[%c2_106, %c0_107] : memref<18x72xf32, #tpu.memory_space<vmem>>, vector<16x72xf32>
    %c1_108 = arith.constant 1 : index
    %c1_109 = arith.constant 1 : index
    %c0_110 = arith.constant 0 : index
    %c0_111 = arith.constant 0 : index
    %98 = vector.load %arg6[%c1_108, %c1_109, %c0_110, %c0_111] : memref<2x2x72x256xf32, #tpu.memory_space<vmem>>, vector<1x1x72x256xf32>
    %99 = vector.shape_cast %98 : vector<1x1x72x256xf32> to vector<72x256xf32>
    %cst_112 = arith.constant dense<0.000000e+00> : vector<16x256xf32>
    %100 = tpu.matmul %97, %99, %cst_112 {dimension_numbers = #tpu.dot_dimension_numbers<[1], [0], [0], [1], [0, 0, 1, 1], [], []>} : vector<16x72xf32>, vector<72x256xf32>, vector<16x256xf32> -> vector<16x256xf32>
    %101 = arith.addf %91, %100 : vector<16x256xf32>
    %c0_113 = arith.constant 0 : index
    %c0_114 = arith.constant 0 : index
    %102 = vector.load %arg5[%c0_113, %c0_114] : memref<1x256xf32, #tpu.memory_space<vmem>>, vector<1x256xf32>
    %103 = vector.broadcast %102 : vector<1x256xf32> to vector<16x256xf32>
    %104 = arith.addf %96, %103 : vector<16x256xf32>
    %cst_115 = arith.constant 0.000000e+00 : f32
    %105 = vector.broadcast %cst_115 : f32 to vector<16x256xf32>
    %106 = arith.cmpf oge, %104, %105 : vector<16x256xf32>
    %cst_116 = arith.constant 5.000000e-02 : f32
    %107 = vector.broadcast %cst_116 : f32 to vector<16x256xf32>
    %108 = arith.mulf %107, %104 : vector<16x256xf32>
    %109 = arith.select %106, %104, %108 : vector<16x256xi1>, vector<16x256xf32>
    %c0_117 = arith.constant 0 : index
    %c0_118 = arith.constant 0 : index
    %110 = vector.load %arg7[%c0_117, %c0_118] : memref<1x256xf32, #tpu.memory_space<vmem>>, vector<1x256xf32>
    %111 = vector.broadcast %110 : vector<1x256xf32> to vector<16x256xf32>
    %112 = arith.addf %101, %111 : vector<16x256xf32>
    %cst_119 = arith.constant 0.000000e+00 : f32
    %113 = vector.broadcast %cst_119 : f32 to vector<16x256xf32>
    %114 = arith.cmpf oge, %112, %113 : vector<16x256xf32>
    %cst_120 = arith.constant 5.000000e-02 : f32
    %115 = vector.broadcast %cst_120 : f32 to vector<16x256xf32>
    %116 = arith.mulf %115, %112 : vector<16x256xf32>
    %117 = arith.select %114, %112, %116 : vector<16x256xi1>, vector<16x256xf32>
    %118 = arith.addf %109, %117 : vector<16x256xf32>
    %c0_121 = arith.constant 0 : index
    %c1_122 = arith.constant 1 : index
    %c0_123 = arith.constant 0 : index
    %c0_124 = arith.constant 0 : index
    %119 = vector.load %arg8[%c0_121, %c1_122, %c0_123, %c0_124] : memref<1x2x16x256xf32, #tpu.memory_space<vmem>>, vector<1x1x16x256xf32>
    %120 = vector.shape_cast %119 : vector<1x1x16x256xf32> to vector<16x256xf32>
    %121 = vector.shape_cast %118 : vector<16x256xf32> to vector<1x1x16x256xf32>
    tpu.vector_store %arg8[%c0_121, %c1_122, %c0_123, %c0_124], %121 {strides = array<i32>} : memref<1x2x16x256xf32, #tpu.memory_space<vmem>>, vector<1x1x16x256xf32>,
    return
  }
  func.func @transform_0(%arg0: i32) -> (i32, i32, i32) {
    %c0_i32 = arith.constant 0 : i32
    %c0_i32_0 = arith.constant 0 : i32
    %c0_i32_1 = arith.constant 0 : i32
    return %arg0, %c0_i32, %c0_i32_0 : i32, i32, i32
  }
  func.func @transform_1(%arg0: i32) -> (i32, i32, i32) {
    %c0_i32 = arith.constant 0 : i32
    %c0_i32_0 = arith.constant 0 : i32
    %c0_i32_1 = arith.constant 0 : i32
    %c0_i32_2 = arith.constant 0 : i32
    return %c0_i32, %c0_i32_0, %c0_i32_1 : i32, i32, i32
  }
  func.func @transform_2(%arg0: i32) -> (i32, i32) {
    %c0_i32 = arith.constant 0 : i32
    %c0_i32_0 = arith.constant 0 : i32
    %c0_i32_1 = arith.constant 0 : i32
    return %c0_i32, %c0_i32_0 : i32, i32
  }
  func.func @transform_3(%arg0: i32) -> (i32, i32, i32, i32) {
    %c0_i32 = arith.constant 0 : i32
    %c0_i32_0 = arith.constant 0 : i32
    %c0_i32_1 = arith.constant 0 : i32
    %c0_i32_2 = arith.constant 0 : i32
    %c0_i32_3 = arith.constant 0 : i32
    return %c0_i32, %c0_i32_0, %c0_i32_1, %c0_i32_2 : i32, i32, i32, i32
  }
  func.func @transform_4(%arg0: i32) -> (i32, i32) {
    %c0_i32 = arith.constant 0 : i32
    %c0_i32_0 = arith.constant 0 : i32
    %c0_i32_1 = arith.constant 0 : i32
    return %c0_i32, %c0_i32_0 : i32, i32
  }
  func.func @transform_5(%arg0: i32) -> (i32, i32, i32, i32) {
    %c0_i32 = arith.constant 0 : i32
    %c0_i32_0 = arith.constant 0 : i32
    %c0_i32_1 = arith.constant 0 : i32
    %c0_i32_2 = arith.constant 0 : i32
    %c0_i32_3 = arith.constant 0 : i32
    return %c0_i32, %c0_i32_0, %c0_i32_1, %c0_i32_2 : i32, i32, i32, i32
  }
  func.func @transform_6(%arg0: i32) -> (i32, i32) {
    %c0_i32 = arith.constant 0 : i32
    %c0_i32_0 = arith.constant 0 : i32
    %c0_i32_1 = arith.constant 0 : i32
    return %c0_i32, %c0_i32_0 : i32, i32
  }
  func.func @transform_7(%arg0: i32) -> (i32, i32, i32, i32) {
    %c0_i32 = arith.constant 0 : i32
    %c0_i32_0 = arith.constant 0 : i32
    %c0_i32_1 = arith.constant 0 : i32
    %c0_i32_2 = arith.constant 0 : i32
    return %arg0, %c0_i32, %c0_i32_0, %c0_i32_1 : i32, i32, i32, i32
  }
}

</mosaic_0001>

<bundles_post_ra>
// kernel: tile.18
= control target key start
LH: loop header
LB: loop body
LE: loop exit
PB: predicated region body
PF: predicated region fallthrough
CT: control target
= control target key end

     0   :  { %s40_s0 = inlined_call_operand.vmem [shape: f32[8], index: 0, kind: input, shape index: {}]   ;;  %s41_s1 = inlined_call_operand.vmem [shape: f32[32,8], index: 1, kind: output, shape index: {}]  }
   0x1   :  { %v4_v0 = vld [vmem:[%s40_s0] ss:$0 sm:$0xff] }
   0x2   :  { %5 = vst [vmem:[%s41_s1] sm:$0xff] %v4_v0  ;;  %12 = vst [vmem:[%s41_s1 + $0x8] sm:$0xff] %v4_v0 }
   0x3   :  { %13 = vst [vmem:[%s41_s1 + $0x10] sm:$0xff] %v4_v0  ;;  %14 = vst [vmem:[%s41_s1 + $0x18] sm:$0xff] %v4_v0 }

// kernel: tile.14
= control target key start
LH: loop header
LB: loop body
LE: loop exit
PB: predicated region body
PF: predicated region fallthrough
CT: control target
= control target key end

     0   :  { %s28_s0 = inlined_call_operand.vmem [shape: f32[4], index: 0, kind: input, shape index: {}]   ;;  %s29_s1 = inlined_call_operand.vmem [shape: f32[16,4], index: 1, kind: output, shape index: {}]  }
   0x1   :  { %v4_v0 = vld [vmem:[%s28_s0] ss:$0 sm:$0xff] }
   0x2   :  { %5 = vst [vmem:[%s29_s1] sm:$0xff] %v4_v0  ;;  %8 = vst [vmem:[%s29_s1 + $0x8] sm:$0xff] %v4_v0 }

// kernel: tile.15
= control target key start
LH: loop header
LB: loop body
LE: loop exit
PB: predicated region body
PF: predicated region fallthrough
CT: control target
= control target key end

     0   :  { %s131_s10 = smov 60   ;;  %s132_s11 = smov 52   ;;  %vm3_vm0 = vcmask 31744   ;;  %vm9_vm1 = vcmask 523744   ;;  %vm15_vm2 = vcmask 490944   ;;  %vm21_vm3 = vcmask 458144   ;;  %s207_s0 = inlined_call_operand.vmem [shape: f32[16,4], index: 0, kind: input, shape index: {}]   ;;  %s208_s1 = inlined_call_operand.vmem [shape: f32[1,64], index: 1, kind: output, shape index: {}]  }
   0x1   :  { %v101_v0 = vld [vmem:[%s207_s0 + $0xf] sm:$0x1]   ;;  %v103_v1 = vld [vmem:[%s207_s0 + $0xd] sm:$0x1]   ;;  %v102_v2 = vld [vmem:[%s207_s0 + $0xe] sm:$0x1]  }
   0x2   :  { %7 = vrot.lane.b32.xlu0 %v101_v0, %s131_s10  ;;  %19 = vrot.lane.b32.xlu1 %v103_v1, %s132_s11  ;;  %v104_v3 = vld [vmem:[%s207_s0 + $0xc] sm:$0x1]   ;;  %s133_s16 = smov 56   ;;  %s134_s17 = smov 48   ;;  %v105_v4 = vld [vmem:[%s207_s0 + $0xb] sm:$0x1]  }
   0x3   :  { %v106_v5 = vld [vmem:[%s207_s0 + $0xa] sm:$0x1]   ;;  %v2_v6 = vld [vmem:[%s207_s0] sm:$0x1]   ;;  %s135_s24 = smov 44   ;;  %s136_s25 = smov 40  }
   0x4   :  { %4 = vst.msk [vmem:[#allocation0] sm:$0x1] %vm3_vm0, %v2_v6   ;;  %v107_v7 = vld [vmem:[%s207_s0 + $0x9] sm:$0x1]   ;;  %v108_v8 = vld [vmem:[%s207_s0 + $0x8] sm:$0x1]  }
   0x5   :  { %s137_s30 = smov 36   ;;  %s138_s2 = smov 32   ;;  %v109_v9 = vld [vmem:[%s207_s0 + $0x7] sm:$0x1]   ;;  %v110_v10 = vld [vmem:[%s207_s0 + $0x6] sm:$0x1]  }
   0x6   :  { %13 = vrot.lane.b32.xlu0 %v102_v2, %s133_s16  ;;  %25 = vrot.lane.b32.xlu1 %v104_v3, %s134_s17  ;;  %s139_s7 = smov 28   ;;  %s140_s8 = smov 24   ;;  %v111_v11 = vld [vmem:[%s207_s0 + $0x5] sm:$0x1]   ;;  %v112_v12 = vld [vmem:[%s207_s0 + $0x4] sm:$0x1]  }
   0x7   :  { %s141_s13 = smov 20   ;;  %s142_s14 = smov 16   ;;  %v113_v13 = vld [vmem:[%s207_s0 + $0x3] sm:$0x1]   ;;  %v114_v14 = vld [vmem:[%s207_s0 + $0x2] sm:$0x1]  }
   0x8   :  { %s143_s19 = smov 12   ;;  %s144_s20 = smov 8   ;;  %v115_v15 = vld [vmem:[%s207_s0 + $0x1] sm:$0x1]   ;;  %vm27_vm4 = vcmask 425344   ;;  %vm33_vm5 = vcmask 392544  }
   0x9   :  { %s145_s0 = smov 4   ;;  %vm39_vm6 = vcmask 359744   ;;  %vm45_vm7 = vcmask 326944   ;;  %vm51_vm8 = vcmask 294144   ;;  %vm57_vm9 = vcmask 261344  }
   0xa   :  { %31 = vrot.lane.b32.xlu0 %v105_v4, %s135_s24  ;;  %37 = vrot.lane.b32.xlu1 %v106_v5, %s136_s25  ;;  %vm63_vm10 = vcmask 228544   ;;  %vm69_vm11 = vcmask 195744   ;;  %vm75_vm12 = vcmask 162944   ;;  %vm81_vm13 = vcmask 130144  }
   0xb   :  { %vm87_vm14 = vcmask 97344   ;;  %vm93_vm15 = vcmask 64544  }
   0xe   :  { %43 = vrot.lane.b32.xlu0 %v107_v7, %s137_s30  ;;  %49 = vrot.lane.b32.xlu1 %v108_v8, %s138_s2 }
  0x12   :  { %55 = vrot.lane.b32.xlu0 %v109_v9, %s139_s7  ;;  %61 = vrot.lane.b32.xlu1 %v110_v10, %s140_s8 }
  0x16   :  { %67 = vrot.lane.b32.xlu0 %v111_v11, %s141_s13  ;;  %73 = vrot.lane.b32.xlu1 %v112_v12, %s142_s14 }
  0x1a   :  { %79 = vrot.lane.b32.xlu0 %v113_v13, %s143_s19  ;;  %85 = vrot.lane.b32.xlu1 %v114_v14, %s144_s20 }
  0x1e   :  { %91 = vrot.lane.b32.xlu0 %v115_v15, %s145_s0 }
  0x74   :  { %v8_v16 = vpop.permute.xlu0 %7   ;;  %v20_v17 = vpop.permute.xlu1 %19  }
  0x75   :  { %10 = vst.msk [vmem:[#allocation0] sm:$0x1] %vm9_vm1, %v8_v16  }
  0x78   :  { %v14_v18 = vpop.permute.xlu0 %13   ;;  %v26_v19 = vpop.permute.xlu1 %25  }
  0x79   :  { %16 = vst.msk [vmem:[#allocation0] sm:$0x1] %vm15_vm2, %v14_v18  }
  0x7a   :  { %22 = vst.msk [vmem:[#allocation0] sm:$0x1] %vm21_vm3, %v20_v17  }
  0x7b   :  { %28 = vst.msk [vmem:[#allocation0] sm:$0x1] %vm27_vm4, %v26_v19  }
  0x7c   :  { %v32_v20 = vpop.permute.xlu0 %31   ;;  %v38_v21 = vpop.permute.xlu1 %37  }
  0x7d   :  { %34 = vst.msk [vmem:[#allocation0] sm:$0x1] %vm33_vm5, %v32_v20  }
  0x7e   :  { %40 = vst.msk [vmem:[#allocation0] sm:$0x1] %vm39_vm6, %v38_v21  }
  0x80   :  { %v44_v22 = vpop.permute.xlu0 %43   ;;  %v50_v23 = vpop.permute.xlu1 %49  }
  0x81   :  { %46 = vst.msk [vmem:[#allocation0] sm:$0x1] %vm45_vm7, %v44_v22  }
  0x82   :  { %52 = vst.msk [vmem:[#allocation0] sm:$0x1] %vm51_vm8, %v50_v23  }
  0x84   :  { %v56_v24 = vpop.permute.xlu0 %55   ;;  %v62_v25 = vpop.permute.xlu1 %61  }
  0x85   :  { %58 = vst.msk [vmem:[#allocation0] sm:$0x1] %vm57_vm9, %v56_v24  }
  0x86   :  { %64 = vst.msk [vmem:[#allocation0] sm:$0x1] %vm63_vm10, %v62_v25  }
  0x88   :  { %v68_v26 = vpop.permute.xlu0 %67   ;;  %v74_v27 = vpop.permute.xlu1 %73  }
  0x89   :  { %70 = vst.msk [vmem:[#allocation0] sm:$0x1] %vm69_vm11, %v68_v26  }
  0x8a   :  { %76 = vst.msk [vmem:[#allocation0] sm:$0x1] %vm75_vm12, %v74_v27  }
  0x8c   :  { %v80_v28 = vpop.permute.xlu0 %79   ;;  %v86_v29 = vpop.permute.xlu1 %85  }
  0x8d   :  { %82 = vst.msk [vmem:[#allocation0] sm:$0x1] %vm81_vm13, %v80_v28  }
  0x8e   :  { %88 = vst.msk [vmem:[#allocation0] sm:$0x1] %vm87_vm14, %v86_v29  }
  0x90   :  { %v92_v30 = vpop.permute.xlu0 %91  }
  0x91   :  { %94 = vst.msk [vmem:[#allocation0] sm:$0x1] %vm93_vm15, %v92_v30  }
  0x98   :  { %v98_v31 = vld [vmem:[#allocation0] sm:$0x1] }
  0x99   :  { %100 = vst [vmem:[%s208_s1] sm:$0x1] %v98_v31 }

// kernel: tile.19
= control target key start
LH: loop header
LB: loop body
LE: loop exit
PB: predicated region body
PF: predicated region fallthrough
CT: control target
= control target key end

     0   :  { %s7_s6 = smov 3  ;;  %s21_s9 = smov 3  ;;  %vm4_vm0 = vcmask 64512   ;;  %vm11_vm1 = vcmask 1048512   ;;  %vm18_vm2 = vcmask 982912   ;;  %vm25_vm3 = vcmask 917312   ;;  %s232_s0 = inlined_call_operand.vmem [shape: f32[32,8], index: 0, kind: input, shape index: {}]   ;;  %s233_s1 = inlined_call_operand.vmem [shape: f32[1,256], index: 1, kind: output, shape index: {}]  }
   0x1   :  { %v122_v0 = vld [vmem:[%s232_s0 + $0xf] ss:$16 sm:%s7_s6]   ;;  %s153_s10 = smov 120   ;;  %v124_v1 = vld [vmem:[%s232_s0 + $0xd] ss:$16 sm:%s21_s9]   ;;  %s14_s13 = smov 3 }
   0x2   :  { %9 = vrot.lane.b32.xlu0 %v122_v0, %s153_s10  ;;  %s154_s14 = smov 104   ;;  %v123_v2 = vld [vmem:[%s232_s0 + $0xe] ss:$16 sm:%s14_s13]   ;;  %s28_s17 = smov 3  ;;  %vm32_vm4 = vcmask 851712   ;;  %vm39_vm5 = vcmask 786112  }
   0x3   :  { %23 = vrot.lane.b32.xlu1 %v124_v1, %s154_s14  ;;  %v125_v3 = vld [vmem:[%s232_s0 + $0xc] ss:$16 sm:%s28_s17]   ;;  %s35_s20 = smov 3  ;;  %s42_s21 = smov 3  ;;  %vm46_vm6 = vcmask 720512   ;;  %vm53_vm7 = vcmask 654912  }
   0x4   :  { %s155_s22 = smov 112   ;;  %s156_s23 = smov 96   ;;  %v126_v4 = vld [vmem:[%s232_s0 + $0xb] ss:$16 sm:%s35_s20]   ;;  %v127_v5 = vld [vmem:[%s232_s0 + $0xa] ss:$16 sm:%s42_s21]  }
   0x5   :  { %s49_s28 = smov 3  ;;  %s56_s29 = smov 3  ;;  %vm60_vm8 = vcmask 589312   ;;  %vm67_vm9 = vcmask 523712   ;;  %vm74_vm10 = vcmask 458112   ;;  %vm81_vm11 = vcmask 392512  }
   0x6   :  { %16 = vrot.lane.b32.xlu0 %v123_v2, %s155_s22  ;;  %s157_s30 = smov 88   ;;  %s158_s2 = smov 80   ;;  %v128_v6 = vld [vmem:[%s232_s0 + $0x9] ss:$16 sm:%s49_s28]   ;;  %vm88_vm12 = vcmask 326912   ;;  %vm95_vm13 = vcmask 261312  }
   0x7   :  { %30 = vrot.lane.b32.xlu1 %v125_v3, %s156_s23  ;;  %v129_v7 = vld [vmem:[%s232_s0 + $0x8] ss:$16 sm:%s56_s29]   ;;  %s63_s7 = smov 3  ;;  %s70_s8 = smov 3  ;;  %vm102_vm14 = vcmask 195712   ;;  %vm109_vm15 = vcmask 130112  }
   0x8   :  { %s159_s9 = smov 72   ;;  %s160_s10 = smov 64   ;;  %v130_v8 = vld [vmem:[%s232_s0 + $0x7] ss:$16 sm:%s63_s7]   ;;  %v131_v9 = vld [vmem:[%s232_s0 + $0x6] ss:$16 sm:%s70_s8]  }
   0x9   :  { %s2_s13 = smov 3  ;;  %s77_s16 = smov 3 }
   0xa   :  { %37 = vrot.lane.b32.xlu0 %v126_v4, %s157_s30  ;;  %v3_v10 = vld [vmem:[%s232_s0] ss:$16 sm:%s2_s13]   ;;  %s84_s19 = smov 3  ;;  %s161_s20 = smov 56  }
   0xb   :  { %44 = vrot.lane.b32.xlu1 %v127_v5, %s158_s2  ;;  %5 = vst.msk [vmem:[#allocation0] ss:$8 sm:$0x3] %vm4_vm0, %v3_v10   ;;  %s162_s21 = smov 48   ;;  %v132_v11 = vld [vmem:[%s232_s0 + $0x5] ss:$16 sm:%s77_s16]  }
   0xc   :  { %v133_v12 = vld [vmem:[%s232_s0 + $0x4] ss:$16 sm:%s84_s19]   ;;  %s91_s26 = smov 3  ;;  %s98_s27 = smov 3 }
   0xd   :  { %s163_s28 = smov 40   ;;  %s164_s29 = smov 32   ;;  %v134_v13 = vld [vmem:[%s232_s0 + $0x3] ss:$16 sm:%s91_s26]   ;;  %v135_v14 = vld [vmem:[%s232_s0 + $0x2] ss:$16 sm:%s98_s27]  }
   0xe   :  { %51 = vrot.lane.b32.xlu0 %v128_v6, %s159_s9  ;;  %s105_s5 = smov 3  ;;  %s165_s6 = smov 24  }
   0xf   :  { %58 = vrot.lane.b32.xlu1 %v129_v7, %s160_s10  ;;  %s166_s7 = smov 16   ;;  %v136_v15 = vld [vmem:[%s232_s0 + $0x1] ss:$16 sm:%s105_s5]   ;;  %s167_s0 = smov 8  }
  0x12   :  { %65 = vrot.lane.b32.xlu0 %v130_v8, %s161_s20 }
  0x13   :  { %72 = vrot.lane.b32.xlu1 %v131_v9, %s162_s21 }
  0x16   :  { %79 = vrot.lane.b32.xlu0 %v132_v11, %s163_s28 }
  0x17   :  { %86 = vrot.lane.b32.xlu1 %v133_v12, %s164_s29 }
  0x1a   :  { %93 = vrot.lane.b32.xlu0 %v134_v13, %s165_s6 }
  0x1b   :  { %100 = vrot.lane.b32.xlu1 %v135_v14, %s166_s7 }
  0x1e   :  { %107 = vrot.lane.b32.xlu0 %v136_v15, %s167_s0 }
  0x74   :  { %v10_v16 = vpop.permute.xlu0 %9  }
  0x75   :  { %12 = vst.msk [vmem:[#allocation0] ss:$8 sm:$0x3] %vm11_vm1, %v10_v16   ;;  %v24_v17 = vpop.permute.xlu1 %23  }
  0x78   :  { %v17_v18 = vpop.permute.xlu0 %16  }
  0x79   :  { %19 = vst.msk [vmem:[#allocation0] ss:$8 sm:$0x3] %vm18_vm2, %v17_v18   ;;  %v31_v19 = vpop.permute.xlu1 %30  }
  0x7a   :  { %26 = vst.msk [vmem:[#allocation0] ss:$8 sm:$0x3] %vm25_vm3, %v24_v17  }
  0x7b   :  { %33 = vst.msk [vmem:[#allocation0] ss:$8 sm:$0x3] %vm32_vm4, %v31_v19  }
  0x7c   :  { %v38_v20 = vpop.permute.xlu0 %37  }
  0x7d   :  { %40 = vst.msk [vmem:[#allocation0] ss:$8 sm:$0x3] %vm39_vm5, %v38_v20   ;;  %v45_v21 = vpop.permute.xlu1 %44  }
  0x7e   :  { %47 = vst.msk [vmem:[#allocation0] ss:$8 sm:$0x3] %vm46_vm6, %v45_v21  }
  0x80   :  { %v52_v22 = vpop.permute.xlu0 %51  }
  0x81   :  { %54 = vst.msk [vmem:[#allocation0] ss:$8 sm:$0x3] %vm53_vm7, %v52_v22   ;;  %v59_v23 = vpop.permute.xlu1 %58  }
  0x82   :  { %61 = vst.msk [vmem:[#allocation0] ss:$8 sm:$0x3] %vm60_vm8, %v59_v23  }
  0x84   :  { %v66_v24 = vpop.permute.xlu0 %65  }
  0x85   :  { %68 = vst.msk [vmem:[#allocation0] ss:$8 sm:$0x3] %vm67_vm9, %v66_v24   ;;  %v73_v25 = vpop.permute.xlu1 %72  }
  0x86   :  { %75 = vst.msk [vmem:[#allocation0] ss:$8 sm:$0x3] %vm74_vm10, %v73_v25  }
  0x88   :  { %v80_v26 = vpop.permute.xlu0 %79  }
  0x89   :  { %82 = vst.msk [vmem:[#allocation0] ss:$8 sm:$0x3] %vm81_vm11, %v80_v26   ;;  %v87_v27 = vpop.permute.xlu1 %86  }
  0x8a   :  { %89 = vst.msk [vmem:[#allocation0] ss:$8 sm:$0x3] %vm88_vm12, %v87_v27  }
  0x8c   :  { %v94_v28 = vpop.permute.xlu0 %93  }
  0x8d   :  { %96 = vst.msk [vmem:[#allocation0] ss:$8 sm:$0x3] %vm95_vm13, %v94_v28   ;;  %v101_v29 = vpop.permute.xlu1 %100  }
  0x8e   :  { %103 = vst.msk [vmem:[#allocation0] ss:$8 sm:$0x3] %vm102_vm14, %v101_v29  }
  0x90   :  { %v108_v30 = vpop.permute.xlu0 %107  }
  0x91   :  { %110 = vst.msk [vmem:[#allocation0] ss:$8 sm:$0x3] %vm109_vm15, %v108_v30  }
  0x98   :  { %v114_v31 = vld [vmem:[#allocation0] sm:$0x1]  ;;  %v118_v32 = vld [vmem:[#allocation0 + $0x8] sm:$0x1] }
  0x99   :  { %116 = vst [vmem:[%s233_s1] sm:$0x1] %v114_v31  ;;  %137 = vst [vmem:[%s233_s1 + $0x1] sm:$0x1] %v118_v32 }

// kernel: residual_upsample_block.1
= control target key start
LH: loop header
LB: loop body
LE: loop exit
PB: predicated region body
PF: predicated region fallthrough
CT: control target
= control target key end

     0   :  { %12 = vsyncpa [#allocation5], 0  ;;  %s2737_s0 = inlined_call_operand.vmem [shape: f32[2,16,64], index: 0, kind: input, shape index: {}]   ;;  %s2738_s1 = inlined_call_operand.hbm [shape: f32[3,72,64], index: 1, kind: input, shape index: {}]   ;;  %s2739_s2 = inlined_call_operand.vmem [shape: f32[1,64], index: 2, kind: input, shape index: {}]   ;;  %s2740_s3 = inlined_call_operand.hbm [shape: f32[2,2,72,256], index: 3, kind: input, shape index: {}]   ;;  %s2741_s4 = inlined_call_operand.vmem [shape: f32[1,256], index: 4, kind: input, shape index: {}]   ;;  %s2742_s5 = inlined_call_operand.vmem [shape: f32[2,2,72,256], index: 5, kind: input, shape index: {}]   ;;  %s2743_s6 = inlined_call_operand.vmem [shape: f32[1,256], index: 6, kind: input, shape index: {}]   ;;  %s2744_s7 = inlined_call_operand.vmem [shape: f32[2,2,16,256], index: 7, kind: output, shape index: {}]  }
   0x1   :  { %13 = vsyncpa [#allocation7], 0  ;;  %s2240_s24 = smov 0  }
   0x2 LB: > { %s2192_s25 = smov [#allocation4]   ;;  %s2246_s27 = sadd.s32 4294967295, %s2190_s24   ;;  %s2190_s24 = sphi %s2240_s24, %s19_s24  }
   0x3   : > { %s214_s26 = sshll.u32 %s2192_s25, 4  ;;  %p1687_p0 = scmp.ge.s32.totalorder %s2190_s24, 1  ;;  %s215_s26 = int_to_ptr.vmem [resolvable:$true] %s214_s26 }
   0x4   : > { %p202_p1 = scmp.lt.s32.totalorder %s2190_s24, 3  ;;  %p2745_p3 = scmp.eq.s32.totalorder %s2246_s27, 0 }
   0x5   : > { %s2193_s29 = smov [#allocation6]   ;;  %s2120_s11 = scalar_lea.hbm %s2738_s1, 3456 }
   0x6   : > { %p2250_p2 = pnand %p1687_p0, %p202_p1  ;;  %s230_s30 = sshll.u32 %s2193_s29, 4  ;;  %s2263_s30 = int_to_ptr.vmem [resolvable:$true] %s230_s30 }
   0x7   : > { %p2121_p6 = scmp.ne.s32.totalorder %s2738_s1, %s2120_s11  ;;  %p2127_p10 = scmp.lt.u32.totalorder %s2120_s11, %s2738_s1 }
   0x8   : > { %s2747_s28 = scalar_select %p2250_p2, 1, 0 }
   0x9   : > { %p2093_p4 = pneg %p2250_p2 }
   0xb   : > { %p2259_p5 = pnand %p2745_p3, %p2093_p4 }
   0xd   : > { %p2122_p7 = pneg %p2259_p5 }
   0xf   : > { %p2123_p8 = pnand %p2122_p7, %p2121_p6 }
  0x11   : > { %p2124_p9 = pneg %p2123_p8 }
  0x13   : > { %p2129_p11 = pnand %p2127_p10, %p2124_p9 }
  0x15   : > { %2132 = shalt.err (!%p2129_p11)
}
  0x16   : > { %s2133_s16 = scalar_lea.vmem %s215_s26, 3456  ;;  %p2141_p1 = scmp.lt.s32.totalorder %s215_s26, %s215_s26 }
  0x17   : > { %p2134_p12 = scmp.ne.s32.totalorder %s215_s26, %s2133_s16  ;;  %p2142_p4 = scmp.lt.s32.totalorder %s2133_s16, %s2133_s16 }
  0x19   : > { %p2136_p13 = pnand %p2134_p12, %p2122_p7  ;;  %p2143_p3 = por %p2142_p4, %p2141_p1 }
  0x1b   : > { %p2137_p0 = pneg %p2136_p13 }
  0x1d   : > { %p2144_p2 = pnand %p2143_p3, %p2137_p0 }
  0x1f   : > { %2147 = shalt.err (!%p2144_p2)
}
  0x20   : > { %s2194_s17 = smov 128   ;;  %s2195_s18 = smov 8  }
  0x21   : > { %2096 = dma.hbm_to_vmem [thread:$0]  (!%p2259_p5), %s2738_s1, 3456, %s215_s26, [#allocation5], %s2194_s17, %s2194_s17, %s2195_s18  }
  0x22   : > { %s2148_s23 = scalar_lea.hbm %s2740_s3, 9216 }
  0x23   : > { %p2149_p6 = scmp.ne.s32.totalorder %s2740_s3, %s2148_s23  ;;  %p2155_p8 = scmp.lt.u32.totalorder %s2148_s23, %s2740_s3 }
  0x25   : > { %p2151_p2 = pnand %p2149_p6, %p2122_p7 }
  0x27   : > { %p2152_p3 = pneg %p2151_p2 }
  0x29   : > { %p2157_p9 = pnand %p2155_p8, %p2152_p3 }
  0x2b   : > { %2160 = shalt.err (!%p2157_p9)
}
  0x2c   : > { %s2161_s26 = scalar_lea.vmem %s2263_s30, 9216  ;;  %p2169_p13 = scmp.lt.s32.totalorder %s2263_s30, %s2263_s30 }
  0x2d   : > { %p2162_p10 = scmp.ne.s32.totalorder %s2263_s30, %s2161_s26  ;;  %p2170_p0 = scmp.lt.s32.totalorder %s2161_s26, %s2161_s26 }
  0x2f   : > { %p2164_p11 = pnand %p2162_p10, %p2122_p7  ;;  %p2171_p1 = por %p2170_p0, %p2169_p13 }
  0x31   : > { %p2165_p12 = pneg %p2164_p11 }
  0x33   : > { %p2172_p4 = pnand %p2171_p1, %p2165_p12 }
  0x35   : > { %2175 = shalt.err (!%p2172_p4)
}
  0x36   : > { %s2196_s11 = smov 256   ;;  %s2197_s12 = smov 16  }
  0x37   : > { %2099 = dma.hbm_to_vmem [thread:$0]  (!%p2259_p5), %s2740_s3, 9216, %s2263_s30, [#allocation7], %s2196_s11, %s2196_s11, %s2197_s12  }
  0x38   : > { %p2749_p6 = scmp.ne.s32.totalorder %s2747_s28, 0 }
  0x39   : > { %p2750_p7 = scmp.eq.s32.totalorder (!%p2749_p6), %s2246_s27, 0 }
  0x3a   : > { %263 = sbr.rel (%p2749_p6) target bundleno = 893 (0x37d), region = 48 }
  0x41   : > { %2181 = dma.done.wait (%p2750_p7), [#allocation5], 3456   ;;  %p2751_p2 = pmov %p2750_p7 }
  0x43   : > { %2183 = vsyncadd (%p2751_p2), [#allocation5], 4294963840  ;;  %p2752_p3 = pmov %p2751_p2 }
  0x44   : > { %p2753_p8 = pmov %p2751_p2 }
  0x45   : > { %2185 = dma.done.wait (%p2752_p3), [#allocation7], 9216  }
  0x46   : > { %2187 = vsyncadd (%p2753_p8), [#allocation7], 4294958080  ;;  %p299_p9 = scmp.lt.s32.totalorder %s2246_s27, 1  ;;  %vm309_vm0 = vcmask 581632   ;;  %vm312_vm1 = vcmask 31744   ;;  %vm317_vm2 = vcmask 589344  }
  0x47   : > { %v2198_v0 = vmov 0.0   ;;  %vm315_vm3 = vcmask 25600   ;;  %vm320_vm4 = vcmask 583200   ;;  %v357_v2 = vld [vmem:[#allocation4 + $0x48] sm:$0xff]  ;;  %s2199_s16 = smov 4   ;;  %v358_v3 = vld [vmem:[#allocation4 + $0x50] sm:$0xff] }
  0x48   : > { %310 = vst.msk [vmem:[#allocation2] sm:$0x1] %vm309_vm0, %v2198_v0  ;;  %311 = vst.msk [vmem:[#allocation2 + $0x11] sm:$0x1] %vm309_vm0, %v2198_v0  ;;  %780 = vmatprep.mubr.f32.mxu1 %v2198_v0  ;;  %s2755_s27 = smov (!%p299_p9, %s2246_s27), 1  ;;  %v359_v4 = vld [vmem:[#allocation4 + $0x58] sm:$0xff]  ;;  %v1879_v7 = vpack.c.bf16 %v358_v3, %v357_v2 }
  0x49   : > { %322 = vst.msk [vmem:[#allocation3] sm:$0x1] %vm309_vm0, %v2198_v0  ;;  %323 = vst.msk [vmem:[#allocation3 + $0x11] sm:$0x1] %vm309_vm0, %v2198_v0  ;;  %s1781_s28 = sshll.u32 %s2755_s27, 4  ;;  %v360_v5 = vld [vmem:[#allocation4 + $0x60] sm:$0xff] }
  0x4a   : > { %313 = vst.msk [vmem:[#allocation2] sm:$0xff] %vm312_vm1, %v2198_v0  ;;  %314 = vst.msk [vmem:[#allocation2 + $0x8] sm:$0xff] %vm312_vm1, %v2198_v0  ;;  %s303_s15 = scalar_lea.vmem %s2737_s0, %s1781_s28  ;;  %v1883_v8 = vpack.c.bf16 %v360_v5, %v359_v4  ;;  %v361_v9 = vld [vmem:[#allocation4 + $0x68] sm:$0xff]  ;;  %v362_v10 = vld [vmem:[#allocation4 + $0x70] sm:$0xff]  ;;  %1880 = vmatprep.subr.bf16.mxu0 %v1879_v7  ;;  %vm340_vm5 = vcmask 556064   ;;  %vm366_vm6 = vcmask 588800  }
  0x4b   : > { %325 = vst.msk [vmem:[#allocation3 + $0x8] sm:$0xff] %vm312_vm1, %v2198_v0  ;;  %324 = vst.msk [vmem:[#allocation3] sm:$0xff] %vm312_vm1, %v2198_v0  ;;  %v330_v1 = vld [vmem:[%s303_s15] sm:$0xff]  ;;  %v331_v6 = vld [vmem:[%s303_s15 + $0x8] sm:$0xff]  ;;  %1882 = vmatpush3.bf16.msra.mxu0 %v1879_v7  ;;  %v1887_v11 = vpack.c.bf16 %v362_v10, %v361_v9  ;;  %s1782_s20 = sshll.u32 %s2755_s27, 6 }
  0x4c   : > { %316 = vst.msk [vmem:[#allocation2 + $0x10] sm:$0x3] %vm315_vm3, %v2198_v0  ;;  %326 = vst.msk [vmem:[#allocation3 + $0x10] sm:$0x3] %vm315_vm3, %v2198_v0  ;;  %334 = vrot.lane.b32.xlu0 %v330_v1, %s2199_s16  ;;  %1884 = vmatprep.subr.bf16.mxu0 %v1883_v8  ;;  %v363_v12 = vld [vmem:[#allocation4 + $0x78] sm:$0xff]  ;;  %v364_v13 = vld [vmem:[#allocation4 + $0x80] sm:$0xff]  ;;  %s2711_s23 = scalar_lea.vmem %s2744_s7, %s1782_s20 }
  0x4d   : > { %318 = vst.msk [vmem:[#allocation2] sm:$0xff] %vm317_vm2, %v2198_v0  ;;  %319 = vst.msk [vmem:[#allocation2 + $0x8] sm:$0xff] %vm317_vm2, %v2198_v0  ;;  %v1891_v14 = vpack.c.bf16 %v364_v13, %v363_v12  ;;  %v365_v15 = vld [vmem:[#allocation4 + $0x88] sm:$0xff]  ;;  %v345_v16 = vld [vmem:[#allocation4] sm:$0xff] }
  0x4e   : > { %328 = vst.msk [vmem:[#allocation3 + $0x8] sm:$0xff] %vm317_vm2, %v2198_v0  ;;  %327 = vst.msk [vmem:[#allocation3] sm:$0xff] %vm317_vm2, %v2198_v0  ;;  %v346_v17 = vld [vmem:[#allocation4 + $0x8] sm:$0xff]  ;;  %v347_v22 = vld [vmem:[#allocation4 + $0x10] sm:$0xff] }
  0x4f   : > { %321 = vst.msk [vmem:[#allocation2 + $0x10] sm:$0x3] %vm320_vm4, %v2198_v0  ;;  %329 = vst.msk [vmem:[#allocation3 + $0x10] sm:$0x3] %vm320_vm4, %v2198_v0  ;;  %1886 = vmatpush3.bf16.msra.mxu0 %v1883_v8  ;;  %v1895_v18 = vpack.c.bf16 %v346_v17, %v345_v16  ;;  %v348_v23 = vld [vmem:[#allocation4 + $0x18] sm:$0xff]  ;;  %v349_v26 = vld [vmem:[#allocation4 + $0x20] sm:$0xff] }
  0x50   : > { %336 = vrot.lane.b32.xlu0 %v331_v6, %s2199_s16  ;;  %1888 = vmatprep.subr.bf16.mxu0 %v1887_v11  ;;  %v1899_v24 = vpack.c.bf16 %v348_v23, %v347_v22  ;;  %v350_v27 = vld [vmem:[#allocation4 + $0x28] sm:$0xff]  ;;  %v351_v30 = vld [vmem:[#allocation4 + $0x30] sm:$0xff]  ;;  %v352_v31 = vld [vmem:[#allocation4 + $0x38] sm:$0xff] }
  0x51   : > { %v1903_v29 = vpack.c.bf16 %v350_v27, %v349_v26  ;;  %v1907_v32 = vpack.c.bf16 %v352_v31, %v351_v30  ;;  %v353_v33 = vld [vmem:[#allocation4 + $0x40] sm:$0xff]  ;;  %v532_v34 = vld [vmem:[#allocation4 + $0x90] sm:$0xff]  ;;  %v533_v35 = vld [vmem:[#allocation4 + $0x98] sm:$0xff] }
  0x52   : > { %v534_v36 = vld [vmem:[#allocation4 + $0xa0] sm:$0xff]  ;;  %v535_v37 = vld [vmem:[#allocation4 + $0xa8] sm:$0xff]  ;;  %v1911_v38 = vpack.c.bf16 %v533_v35, %v532_v34  ;;  %v536_v41 = vld [vmem:[#allocation4 + $0xb0] sm:$0xff] }
  0x53   : > { %1890 = vmatpush3.bf16.msra.mxu0 %v1887_v11  ;;  %v1915_v39 = vpack.c.bf16 %v535_v37, %v534_v36  ;;  %v537_v42 = vld [vmem:[#allocation4 + $0xb8] sm:$0xff]  ;;  %v538_v45 = vld [vmem:[#allocation4 + $0xc0] sm:$0xff]  ;;  %v539_v46 = vld [vmem:[#allocation4 + $0xc8] sm:$0xff] }
  0x54   : > { %1892 = vmatprep.subr.bf16.mxu0 %v1891_v14  ;;  %v1919_v44 = vpack.c.bf16 %v537_v42, %v536_v41  ;;  %v1923_v47 = vpack.c.bf16 %v539_v46, %v538_v45  ;;  %v540_v48 = vld [vmem:[#allocation4 + $0xd0] sm:$0xff]  ;;  %v695_v51 = vld [vmem:[#allocation6 + $0xa8] sm:$0xff]  ;;  %v692_v52 = vld [vmem:[#allocation6 + $0x90] sm:$0xff] }
  0x55   : > { %v693_v50 = vld [vmem:[#allocation6 + $0x98] sm:$0xff]  ;;  %v694_v54 = vld [vmem:[#allocation6 + $0xa0] sm:$0xff]  ;;  %v699_v56 = vld [vmem:[#allocation6 + $0xc8] sm:$0xff] }
  0x56   : > { %v1927_v53 = vpack.c.bf16 %v695_v51, %v693_v50  ;;  %v697_v55 = vld [vmem:[#allocation6 + $0xb8] sm:$0xff]  ;;  %v1929_v57 = vpack.c.bf16 %v694_v54, %v692_v52  ;;  %v1175_v60 = vld [vmem:[#allocation6 + $0x1c8] sm:$0xff]  ;;  %v696_v61 = vld [vmem:[#allocation6 + $0xb0] sm:$0xff] }
  0x57   : > { %1894 = vmatpush3.bf16.msra.mxu0 %v1891_v14  ;;  %v1931_v58 = vpack.c.bf16 %v699_v56, %v697_v55  ;;  %v1173_v59 = vld [vmem:[#allocation6 + $0x1b8] sm:$0xff]  ;;  %v698_v63 = vld [vmem:[#allocation6 + $0xc0] sm:$0xff]  ;;  %v1172_v1 = vld [vmem:[#allocation6 + $0x1b0] sm:$0xff] }
  0x58   : > { %1832 = vmatprep.subr.mxu0 %v365_v15  ;;  %1928 = vmatprep.subr.bf16.mxu1 %v1927_v53  ;;  %v1991_v62 = vpack.c.bf16 %v1175_v60, %v1173_v59  ;;  %v1174_v2 = vld [vmem:[#allocation6 + $0x1c0] sm:$0xff]  ;;  %v1933_v3 = vpack.c.bf16 %v698_v63, %v696_v61  ;;  %v701_v5 = vld [vmem:[#allocation6 + $0xd8] sm:$0xff]  ;;  %v703_v6 = vld [vmem:[#allocation6 + $0xe8] sm:$0xff] }
  0x59   : > { %1930 = vmatpush1.bf16.msra.mxu1 %v1929_v57  ;;  %v1993_v4 = vpack.c.bf16 %v1174_v2, %v1172_v1  ;;  %v1177_v7 = vld [vmem:[#allocation6 + $0x1d8] sm:$0xff]  ;;  %v1935_v8 = vpack.c.bf16 %v703_v6, %v701_v5  ;;  %v1179_v9 = vld [vmem:[#allocation6 + $0x1e8] sm:$0xff]  ;;  %v700_v10 = vld [vmem:[#allocation6 + $0xd0] sm:$0xff] }
  0x5a   : > { %1932 = vmatprep.subr.bf16.mxu1 %v1931_v58  ;;  %v702_v11 = vld [vmem:[#allocation6 + $0xe0] sm:$0xff]  ;;  %v1995_v12 = vpack.c.bf16 %v1179_v9, %v1177_v7  ;;  %v1176_v13 = vld [vmem:[#allocation6 + $0x1d0] sm:$0xff]  ;;  %v705_v17 = vld [vmem:[#allocation6 + $0xf8] sm:$0xff] }
  0x5b   : > { %1833 = vmatpush3.msra.mxu0 %v365_v15  ;;  %v1178_v14 = vld [vmem:[#allocation6 + $0x1e0] sm:$0xff]  ;;  %v1937_v16 = vpack.c.bf16 %v702_v11, %v700_v10  ;;  %v1183_v22 = vld [vmem:[#allocation6 + $0x208] sm:$0xff]  ;;  %v704_v23 = vld [vmem:[#allocation6 + $0xf0] sm:$0xff] }
  0x5c   : > { %1896 = vmatprep.subr.bf16.mxu0 %v1895_v18  ;;  %v1997_v15 = vpack.c.bf16 %v1178_v14, %v1176_v13  ;;  %v1182_v30 = vld [vmem:[#allocation6 + $0x200] sm:$0xff]  ;;  %v1184_v35 = vld [vmem:[#allocation6 + $0x210] sm:$0xff]  ;;  %v709_v37 = vld [vmem:[#allocation6 + $0x118] sm:$0xff] }
  0x5d   : > { %1934 = vmatpush1.bf16.msra.mxu1 %v1933_v3  ;;  %v1186_v36 = vld [vmem:[#allocation6 + $0x220] sm:$0xff]  ;;  %v652_v41 = vld [vmem:[#allocation6 + $0x8] sm:$0xff]  ;;  %v1704_v42 = vld [vmem:[%s2739_s2] ss:$0 sm:$0xff] }
  0x5e   : > { %1936 = vmatprep.subr.bf16.mxu1 %v1935_v8  ;;  %v1189_v51 = vld [vmem:[#allocation6 + $0x238] sm:$0xff]  ;;  %v1188_v52 = vld [vmem:[#allocation6 + $0x230] sm:$0xff]  ;;  %v1131_v54 = vld [vmem:[#allocation6 + $0x128] sm:$0xff] }
  0x5f   : > { %v1133_v55 = vld [vmem:[#allocation6 + $0x138] sm:$0xff]  ;;  %v651_v61 = vld [vmem:[#allocation6] sm:$0xff]  ;;  %v656_v1 = vld [vmem:[#allocation6 + $0x28] sm:$0xff] }
  0x60   : > { %v2007_v56 = vpack.c.bf16 %v1133_v55, %v1131_v54  ;;  %v658_v2 = vld [vmem:[#allocation6 + $0x38] sm:$0xff]  ;;  %v657_v6 = vld [vmem:[#allocation6 + $0x30] sm:$0xff]  ;;  %v1130_v7 = vld [vmem:[#allocation6 + $0x120] sm:$0xff] }
  0x61   : > { %1938 = vmatpush1.bf16.msra.mxu1 %v1937_v16  ;;  %v1947_v5 = vpack.c.bf16 %v658_v2, %v656_v1  ;;  %v1132_v8 = vld [vmem:[#allocation6 + $0x130] sm:$0xff]  ;;  %v660_v10 = vld [vmem:[#allocation6 + $0x48] sm:$0xff]  ;;  %v662_v11 = vld [vmem:[#allocation6 + $0x58] sm:$0xff] }
  0x62   : > { %v1137_v13 = vld [vmem:[#allocation6 + $0x158] sm:$0xff]  ;;  %v659_v14 = vld [vmem:[#allocation6 + $0x40] sm:$0xff]  ;;  %v2009_v16 = vpack.c.bf16 %v1132_v8, %v1130_v7  ;;  %v1733_v7 = vld [vmem:[%s2742_s5 + $0x130] sm:$0xff] }
  0x63   : > { %v1711_v54 = vld [vmem:[%s2742_s5 + $0xa0] sm:$0xff]  ;;  %v1146_v1 = vld [vmem:[#allocation6 + $0x1a0] sm:$0xff]  ;;  %v1718_v8 = vld [vmem:[%s2742_s5 + $0xd8] sm:$0xff] }
  0xbe   : > { %v335_v19 = vpop.permute.xlu0 %334 }
  0xbf   : > { %341 = vst.msk [vmem:[#allocation2 + $0x1] sm:$0xff] %vm340_vm5, %v335_v19  ;;  %v1181_v19 = vld [vmem:[#allocation6 + $0x1f8] sm:$0xff] }
  0xc0   : > { %v1999_v26 = vpack.c.bf16 %v1183_v22, %v1181_v19  ;;  %v1136_v19 = vld [vmem:[#allocation6 + $0x150] sm:$0xff]  ;;  %v664_v22 = vld [vmem:[#allocation6 + $0x68] sm:$0xff] }
  0xc2   : > { %v337_v20 = vpop.permute.xlu0 %336 }
  0xc3   : > { %342 = vst.msk [vmem:[#allocation2 + $0x9] sm:$0xff] %vm340_vm5, %v337_v20 }
  0xc6   : > { %v2355_v21 = vld [vmem:[#allocation2 + $0x1] sm:$0xff] }
  0xc7   : > { %1834 = vmatprep.mubr.msk.f32.mxu0 %vm366_vm6, %v2355_v21  ;;  %v2363_v28 = vld [vmem:[#allocation2] sm:$0xff] }
  0xca   : > { %v2359_v25 = vld [vmem:[#allocation2 + $0x9] sm:$0xff] }
  0xcb   : > { %1835 = vmatmul.mubr.msk.f32.vlgmr.msra.gmra.mrb[0].mxu0 %vm366_vm6, %v2359_v25  ;;  %v2367_v40 = vld [vmem:[#allocation2 + $0x8] sm:$0xff] }
  0xcc   : > { %1898 = vmatpush3.bf16.msra.mxu0 %v1895_v18  ;;  %1855 = vmatprep.mubr.msk.f32.mxu0 %vm366_vm6, %v2363_v28  ;;  %v2371_v43 = vld [vmem:[#allocation2 + $0x2] sm:$0xff]  ;;  %v2375_v49 = vld [vmem:[#allocation2 + $0xa] sm:$0xff] }
  0xcd   : > { %1900 = vmatprep.subr.bf16.mxu0 %v1899_v24  ;;  %v707_v18 = vld [vmem:[#allocation6 + $0x108] sm:$0xff] }
  0xce   : > { %v1939_v20 = vpack.c.bf16 %v707_v18, %v705_v17  ;;  %v661_v17 = vld [vmem:[#allocation6 + $0x50] sm:$0xff]  ;;  %v1134_v18 = vld [vmem:[#allocation6 + $0x140] sm:$0xff] }
  0xd0   : > { %1902 = vmatpush3.bf16.msra.mxu0 %v1899_v24  ;;  %v706_v24 = vld [vmem:[#allocation6 + $0x100] sm:$0xff]  ;;  %1940 = vmatprep.subr.bf16.mxu1 %v1939_v20  ;;  %v1951_v20 = vpack.c.bf16 %v662_v11, %v660_v10 }
  0xd1   : > { %1904 = vmatprep.subr.bf16.mxu0 %v1903_v29  ;;  %v1941_v27 = vpack.c.bf16 %v706_v24, %v704_v23  ;;  %v666_v23 = vld [vmem:[#allocation6 + $0x78] sm:$0xff]  ;;  %v1139_v24 = vld [vmem:[#allocation6 + $0x168] sm:$0xff]  ;;  %v1720_v10 = vld [vmem:[%s2742_s5 + $0xe8] sm:$0xff] }
  0xd2   : > { %v1736_v11 = vld [vmem:[%s2742_s5 + $0x148] sm:$0xff] }
  0xd3   : > { %1942 = vmatpush1.bf16.msra.mxu1 %v1941_v27 }
  0xd4   : > { %1906 = vmatpush3.bf16.msra.mxu0 %v1903_v29  ;;  %v1180_v29 = vld [vmem:[#allocation6 + $0x1f0] sm:$0xff]  ;;  %732 = vmatprep.subr.mxu1 %v709_v37  ;;  %v1138_v37 = vld [vmem:[#allocation6 + $0x160] sm:$0xff] }
  0xd5   : > { %1908 = vmatprep.subr.bf16.mxu0 %v1907_v32  ;;  %v2001_v31 = vpack.c.bf16 %v1182_v30, %v1180_v29  ;;  %v1141_v30 = vld [vmem:[#allocation6 + $0x178] sm:$0xff] }
  0xd8   : > { %1910 = vmatpush3.bf16.msra.mxu0 %v1907_v32  ;;  %v1185_v32 = vld [vmem:[#allocation6 + $0x218] sm:$0xff] }
  0xd9   : > { %1853 = vmatprep.subr.mxu0 %v353_v33 }
  0xdc   : > { %1854 = vmatpush3.msra.mxu0 %v353_v33  ;;  %v1187_v33 = vld [vmem:[#allocation6 + $0x228] sm:$0xff] }
  0xdd   : > { %1856 = vmatmul.mubr.msk.f32.vlgmr.msra.gmra.mrb[0].mxu0 %vm366_vm6, %v2367_v40  ;;  %1912 = vmatprep.subr.bf16.mxu0 %v1911_v38  ;;  %v2003_v34 = vpack.c.bf16 %v1187_v33, %v1185_v32  ;;  %v2013_v32 = vpack.c.bf16 %v1136_v19, %v1134_v18  ;;  %v663_v33 = vld [vmem:[#allocation6 + $0x60] sm:$0xff]  ;;  %v1735_v18 = vld [vmem:[%s2742_s5 + $0x140] sm:$0xff]  ;;  %v1737_v19 = vld [vmem:[%s2742_s5 + $0x150] sm:$0xff] }
  0xde   : > { %1914 = vmatpush3.bf16.msra.mxu0 %v1911_v38  ;;  %1876 = vmatprep.mubr.msk.f32.mxu0 %vm366_vm6, %v2371_v43  ;;  %v708_v38 = vld [vmem:[#allocation6 + $0x110] sm:$0xff] }
  0xdf   : > { %1916 = vmatprep.subr.bf16.mxu0 %v1915_v39  ;;  %733 = vmatpush1.msra.mxu1 %v708_v38  ;;  %v1140_v38 = vld [vmem:[#allocation6 + $0x170] sm:$0xff] }
  0xe2   : > { %1918 = vmatpush3.bf16.msra.mxu0 %v1915_v39  ;;  %v2005_v39 = vpack.c.bf16 %v1186_v36, %v1184_v35  ;;  %v2015_v35 = vpack.c.bf16 %v1141_v30, %v1139_v24  ;;  %v665_v36 = vld [vmem:[#allocation6 + $0x70] sm:$0xff] }
  0xe3   : > { %1920 = vmatprep.subr.bf16.mxu0 %v1919_v44  ;;  %v1722_v24 = vld [vmem:[%s2742_s5 + $0xf8] sm:$0xff] }
  0xe4   : > { %v1742_v30 = vld [vmem:[%s2742_s5 + $0x178] sm:$0xff] }
  0xe6   : > { %1922 = vmatpush3.bf16.msra.mxu0 %v1919_v44  ;;  %v654_v44 = vld [vmem:[#allocation6 + $0x18] sm:$0xff] }
  0xe7   : > { %1924 = vmatprep.subr.bf16.mxu0 %v1923_v47  ;;  %v1943_v46 = vpack.c.bf16 %v654_v44, %v652_v41  ;;  %v1143_v41 = vld [vmem:[#allocation6 + $0x188] sm:$0xff]  ;;  %v1957_v44 = vpack.c.bf16 %v665_v36, %v663_v33  ;;  %v1739_v36 = vld [vmem:[%s2742_s5 + $0x160] sm:$0xff] }
  0xe9   : > { %1944 = vmatprep.subr.bf16.mxu1 %v1943_v46 }
  0xea   : > { %1926 = vmatpush3.bf16.msra.mxu0 %v1923_v47 }
  0xeb   : > { %1874 = vmatprep.subr.mxu0 %v540_v48 }
  0xee   : > { %1875 = vmatpush3.msra.mxu0 %v540_v48 }
  0xef   : > { %1877 = vmatmul.mubr.msk.f32.vlgmr.msra.gmra.mrb[0].mxu0 %vm366_vm6, %v2375_v49  ;;  %1992 = vmatprep.subr.bf16.mxu0 %v1991_v62  ;;  %v653_v62 = vld [vmem:[#allocation6 + $0x10] sm:$0xff] }
  0xf0   : > { %1260 = vmatprep.mubr.f32.mxu0 %v2198_v0  ;;  %1994 = vmatpush1.bf16.msra.mxu0 %v1993_v4  ;;  %v1945_v3 = vpack.c.bf16 %v653_v62, %v651_v61  ;;  %v655_v4 = vld [vmem:[#allocation6 + $0x20] sm:$0xff]  ;;  %v1147_v61 = vld [vmem:[#allocation6 + $0x1a8] sm:$0xff] }
  0xf1   : > { %1996 = vmatprep.subr.bf16.mxu0 %v1995_v12  ;;  %v1135_v12 = vld [vmem:[#allocation6 + $0x148] sm:$0xff]  ;;  %v1732_v62 = vld [vmem:[%s2742_s5 + $0x128] sm:$0xff] }
  0xf2   : > { %v2011_v29 = vpack.c.bf16 %v1137_v13, %v1135_v12  ;;  %v1738_v12 = vld [vmem:[%s2742_s5 + $0x158] sm:$0xff] }
  0xf4   : > { %1998 = vmatpush1.bf16.msra.mxu0 %v1997_v15  ;;  %v1949_v15 = vpack.c.bf16 %v657_v6, %v655_v4  ;;  %v1715_v4 = vld [vmem:[%s2742_s5 + $0xc0] sm:$0xff] }
  0xf5   : > { %2000 = vmatprep.subr.bf16.mxu0 %v1999_v26 }
  0xf8   : > { %2002 = vmatpush1.bf16.msra.mxu0 %v2001_v31  ;;  %v1953_v31 = vpack.c.bf16 %v661_v17, %v659_v14  ;;  %v1719_v17 = vld [vmem:[%s2742_s5 + $0xe0] sm:$0xff] }
  0xf9   : > { %2004 = vmatprep.subr.bf16.mxu0 %v2003_v34  ;;  %v1955_v34 = vpack.c.bf16 %v666_v23, %v664_v22  ;;  %v1967_v22 = vpack.c.bf16 %v1720_v10, %v1718_v8  ;;  %v2467_v23 = vpack.c.bf16 %v1738_v12, %v1736_v11  ;;  %v683_v11 = vld [vmem:[%s2742_s5 + $0x60] sm:$0xff]  ;;  %v685_v12 = vld [vmem:[%s2742_s5 + $0x70] sm:$0xff] }
  0xfc   : > { %2006 = vmatpush1.bf16.msra.mxu0 %v2005_v39 }
  0xfd   : > { %1212 = vmatprep.subr.mxu0 %v1189_v51  ;;  %v1710_v51 = vld [vmem:[%s2742_s5 + $0x98] sm:$0xff] }
 0x100   : > { %1213 = vmatpush1.msra.mxu0 %v1188_v52  ;;  %v1712_v52 = vld [vmem:[%s2742_s5 + $0xa8] sm:$0xff] }
 0x101   : > { %2008 = vmatprep.subr.bf16.mxu0 %v2007_v56  ;;  %v1714_v56 = vld [vmem:[%s2742_s5 + $0xb8] sm:$0xff] }
 0x1c2   : > { %v1878_v45 = vpop.f32.mrb[0].mxu0 }
 0x1c3   : > { %v613_v47 = vpop.f32.mrb[1].mxu0  ;;  %v632_v48 = vadd.f32 %v1878_v45, %v1704_v42  ;;  %v2017_v45 = vpack.c.bf16 %v1140_v38, %v1138_v37  ;;  %v1741_v37 = vld [vmem:[%s2742_s5 + $0x170] sm:$0xff]  ;;  %v1744_v38 = vld [vmem:[%s2742_s5 + $0x188] sm:$0xff] }
 0x1c4   : > { %v631_v50 = vadd.f32 %v1704_v42, %v613_v47  ;;  %v1145_v42 = vld [vmem:[#allocation6 + $0x198] sm:$0xff]  ;;  %v1142_v47 = vld [vmem:[#allocation6 + $0x180] sm:$0xff] }
 0x1c5   : > { %v636_v57 = vmul.f32 0.05, %v632_v48  ;;  %vm634_vm8 = vcmp.ge.f32.partialorder %v632_v48, 0.0  ;;  %v2019_v46 = vpack.c.bf16 %v1145_v42, %v1143_v41  ;;  %v2515_v42 = vpack.c.bf16 %v1741_v37, %v1739_v36 }
 0x1c6   : > { %vm633_vm7 = vcmp.ge.f32.partialorder %v631_v50, 0.0  ;;  %v635_v53 = vmul.f32 0.05, %v631_v50 }
 0x1c7   : > { %v638_v59 = vsel %vm634_vm8, %v632_v48, %v636_v57  ;;  %v1144_v48 = vld [vmem:[#allocation6 + $0x190] sm:$0xff]  ;;  %v1716_v57 = vld [vmem:[%s2742_s5 + $0xc8] sm:$0xff] }
 0x1c8   : > { %v637_v58 = vsel %vm633_vm7, %v631_v50, %v635_v53  ;;  %v668_v50 = vld [vmem:[#allocation6 + $0x88] sm:$0xff]  ;;  %v2021_v55 = vpack.c.bf16 %v1144_v48, %v1142_v47  ;;  %v1963_v2 = vpack.c.bf16 %v1716_v57, %v1714_v56  ;;  %v672_v47 = vld [vmem:[%s2742_s5 + $0x8] sm:$0xff]  ;;  %v674_v48 = vld [vmem:[%s2742_s5 + $0x18] sm:$0xff] }
 0x1c9   : > { %641 = vrot.lane.b32.xlu1 %v637_v58, %s2199_s16  ;;  %v1709_v53 = vld [vmem:[%s2742_s5 + $0x90] sm:$0xff]  ;;  %v667_v58 = vld [vmem:[#allocation6 + $0x80] sm:$0xff]  ;;  %v1975_v56 = vpack.c.bf16 %v674_v48, %v672_v47  ;;  %v1767_v47 = vld [vmem:[%s2742_s5 + $0x220] sm:$0xff] }
 0x1cd   : > { %643 = vrot.lane.b32.xlu1 %v638_v59, %s2199_s16  ;;  %v1959_v59 = vpack.c.bf16 %v1712_v52, %v1710_v51  ;;  %v673_v51 = vld [vmem:[%s2742_s5 + $0x10] sm:$0xff] }
 0x1ce   : > { %v1725_v52 = vld [vmem:[%s2742_s5 + $0x110] sm:$0xff] }
 0x23b   : > { %v642_v60 = vpop.permute.xlu1 %641 }
 0x23c   : > { %647 = vst.msk [vmem:[#allocation3 + $0x1] sm:$0xff] %vm340_vm5, %v642_v60  ;;  %v1961_v60 = vpack.c.bf16 %v1711_v54, %v1709_v53  ;;  %v676_v54 = vld [vmem:[%s2742_s5 + $0x28] sm:$0xff] }
 0x23f   : > { %v644_v63 = vpop.permute.xlu1 %643 }
 0x240   : > { %648 = vst.msk [vmem:[#allocation3 + $0x9] sm:$0xff] %vm340_vm5, %v644_v63  ;;  %v1734_v63 = vld [vmem:[%s2742_s5 + $0x138] sm:$0xff] }
 0x241   : > { %v2450_v13 = vpack.c.bf16 %v1734_v63, %v1732_v62  ;;  %v680_v62 = vld [vmem:[%s2742_s5 + $0x48] sm:$0xff]  ;;  %v682_v63 = vld [vmem:[%s2742_s5 + $0x58] sm:$0xff] }
 0x243   : > { %v2387_v9 = vld [vmem:[#allocation3 + $0x1] sm:$0xff] }
 0x244   : > { %1705 = vmatmul.mubr.msk.f32.vlgmr.msra.gmra.mrb[0].mxu1 %vm366_vm6, %v2387_v9  ;;  %v649_v6 = vld [vmem:[#allocation3] sm:$0xff] }
 0x245   : > { %1946 = vmatpush1.bf16.msra.mxu1 %v1945_v3  ;;  %786 = vmatprep.mubr.f32.mxu1 %v2198_v0  ;;  %v1713_v3 = vld [vmem:[%s2742_s5 + $0xb0] sm:$0xff] }
 0x246   : > { %1948 = vmatprep.subr.bf16.mxu1 %v1947_v5  ;;  %v1731_v5 = vld [vmem:[%s2742_s5 + $0x120] sm:$0xff]  ;;  %v1965_v14 = vpack.c.bf16 %v1715_v4, %v1713_v3  ;;  %v1983_v3 = vpack.c.bf16 %v682_v63, %v680_v62 }
 0x247   : > { %v2392_v26 = vld [vmem:[#allocation3 + $0x9] sm:$0xff] }
 0x248   : > { %v1169_v27 = vld [vmem:[#allocation3 + $0x2] sm:$0xff]  ;;  %1706 = vmatmul.mubr.msk.f32.gmra.mrb[2].mxu1 %vm366_vm6, %v2392_v26  ;;  %v1170_v39 = vld [vmem:[#allocation3 + $0xa] sm:$0xff] }
 0x249   : > { %1749 = vmatmul.mubr.msk.f32.vlgmr.msra.gmra.mrb[2].mxu0 %vm366_vm6, %v1169_v27  ;;  %1950 = vmatpush1.bf16.msra.mxu1 %v1949_v15  ;;  %v1717_v15 = vld [vmem:[%s2742_s5 + $0xd0] sm:$0xff]  ;;  %v1724_v27 = vld [vmem:[%s2742_s5 + $0x108] sm:$0xff]  ;;  %v679_v4 = vld [vmem:[%s2742_s5 + $0x40] sm:$0xff] }
 0x24a   : > { %2010 = vmatpush1.bf16.msra.mxu0 %v2009_v16  ;;  %1952 = vmatprep.subr.bf16.mxu1 %v1951_v20  ;;  %v2456_v16 = vpack.c.bf16 %v1733_v7, %v1731_v5  ;;  %v650_v20 = vld [vmem:[#allocation3 + $0x8] sm:$0xff]  ;;  %v1971_v33 = vpack.c.bf16 %v1724_v27, %v1722_v24  ;;  %v681_v5 = vld [vmem:[%s2742_s5 + $0x50] sm:$0xff]  ;;  %v686_v7 = vld [vmem:[%s2742_s5 + $0x78] sm:$0xff] }
 0x24b   : > { %1266 = vmatprep.mubr.f32.mxu0 %v2198_v0  ;;  %2012 = vmatprep.subr.bf16.mxu0 %v2011_v29  ;;  %v1740_v29 = vld [vmem:[%s2742_s5 + $0x168] sm:$0xff]  ;;  %v1985_v8 = vpack.c.bf16 %v681_v5, %v679_v4  ;;  %v687_v24 = vld [vmem:[%s2742_s5 + $0x80] sm:$0xff] }
 0x24c   : > { %863 = vmatprep.mubr.f32.mxu1 %v2198_v0 }
 0x24d   : > { %1750 = vmatmul.mubr.msk.f32.gmra.mrb[4].mxu0 %vm366_vm6, %v1170_v39  ;;  %1954 = vmatpush1.bf16.msra.mxu1 %v1953_v31  ;;  %v1969_v31 = vpack.c.bf16 %v1719_v17, %v1717_v15  ;;  %v1746_v39 = vld [vmem:[%s2742_s5 + $0x198] sm:$0xff]  ;;  %v1756_v17 = vld [vmem:[%s2742_s5 + $0x1c8] sm:$0xff] }
 0x24e   : > { %2014 = vmatpush1.bf16.msra.mxu0 %v2013_v32  ;;  %1956 = vmatprep.subr.bf16.mxu1 %v1955_v34  ;;  %v2487_v32 = vpack.c.bf16 %v1737_v19, %v1735_v18  ;;  %v1723_v34 = vld [vmem:[%s2742_s5 + $0x100] sm:$0xff]  ;;  %v1754_v15 = vld [vmem:[%s2742_s5 + $0x1b8] sm:$0xff]  ;;  %v1753_v18 = vld [vmem:[%s2742_s5 + $0x1b0] sm:$0xff] }
 0x24f   : > { %2016 = vmatprep.subr.bf16.mxu0 %v2015_v35  ;;  %1343 = vmatprep.mubr.f32.mxu0 %v2198_v0  ;;  %v2496_v35 = vpack.c.bf16 %v1742_v30, %v1740_v29  ;;  %v1755_v19 = vld [vmem:[%s2742_s5 + $0x1c0] sm:$0xff]  ;;  %v2023_v27 = vpack.c.bf16 %v1756_v17, %v1754_v15 }
 0x250   : > { %v2025_v29 = vpack.c.bf16 %v1755_v19, %v1753_v18 }
 0x251   : > { %1958 = vmatpush1.bf16.msra.mxu1 %v1957_v44  ;;  %v2521_v44 = vpack.c.bf16 %v1746_v39, %v1744_v38  ;;  %v1761_v38 = vld [vmem:[%s2742_s5 + $0x1f0] sm:$0xff]  ;;  %v1763_v39 = vld [vmem:[%s2742_s5 + $0x200] sm:$0xff] }
 0x252   : > { %2018 = vmatpush1.bf16.msra.mxu0 %v2017_v45  ;;  %815 = vmatprep.subr.mxu1 %v668_v50  ;;  %v1743_v45 = vld [vmem:[%s2742_s5 + $0x180] sm:$0xff] }
 0x253   : > { %2020 = vmatprep.subr.bf16.mxu0 %v2019_v46  ;;  %v1745_v46 = vld [vmem:[%s2742_s5 + $0x190] sm:$0xff]  ;;  %v671_v50 = vld [vmem:[%s2742_s5] sm:$0xff] }
 0x254   : > { %v2545_v53 = vpack.c.bf16 %v1745_v46, %v1743_v45  ;;  %v1977_v57 = vpack.c.bf16 %v673_v51, %v671_v50  ;;  %v1765_v46 = vld [vmem:[%s2742_s5 + $0x210] sm:$0xff] }
 0x255   : > { %816 = vmatpush1.msra.mxu1 %v667_v58  ;;  %v2557_v58 = vld [vmem:[%s2742_s5 + $0x1a8] sm:$0xff]  ;;  %v2037_v48 = vpack.c.bf16 %v1767_v47, %v1765_v46  ;;  %v1769_v50 = vld [vmem:[%s2742_s5 + $0x230] sm:$0xff] }
 0x256   : > { %2022 = vmatpush1.bf16.msra.mxu0 %v2021_v55  ;;  %1707 = vmatmul.mubr.msk.f32.vlgmr.msra.gmra.mrb[0].mxu1 %vm366_vm6, %v649_v6  ;;  %v678_v55 = vld [vmem:[%s2742_s5 + $0x38] sm:$0xff]  ;;  %v684_v6 = vld [vmem:[%s2742_s5 + $0x68] sm:$0xff] }
 0x257   : > { %1960 = vmatprep.subr.bf16.mxu1 %v1959_v59  ;;  %1295 = vmatprep.subr.mxu0 %v1147_v61  ;;  %v1979_v59 = vpack.c.bf16 %v678_v55, %v676_v54  ;;  %v677_v61 = vld [vmem:[%s2742_s5 + $0x30] sm:$0xff]  ;;  %v1987_v10 = vpack.c.bf16 %v686_v7, %v684_v6  ;;  %v1063_v54 = vld [vmem:[%s2741_s4] sm:$0x3] }
 0x258   : > { %1962 = vmatpush1.bf16.msra.mxu1 %v1961_v60  ;;  %869 = vmatprep.mubr.f32.mxu1 %v2198_v0  ;;  %v675_v60 = vld [vmem:[%s2742_s5 + $0x20] sm:$0xff] }
 0x259   : > { %1964 = vmatprep.subr.bf16.mxu1 %v1963_v2  ;;  %v1981_v2 = vpack.c.bf16 %v677_v61, %v675_v60 }
 0x25a   : > { %1296 = vmatpush1.msra.mxu0 %v1146_v1  ;;  %1708 = vmatmul.mubr.msk.f32.gmra.mrb[2].mxu1 %vm366_vm6, %v650_v20  ;;  %v2578_v1 = vld [vmem:[%s2742_s5 + $0x1a0] sm:$0xff]  ;;  %v1758_v20 = vld [vmem:[%s2742_s5 + $0x1d8] sm:$0xff] }
 0x25b   : > { %1751 = vmatmul.mubr.msk.f32.vlgmr.msra.gmra.mrb[2].mxu0 %vm366_vm6, %v2387_v9  ;;  %2040 = vmatprep.subr.bf16.mxu0 %v2450_v13  ;;  %v1721_v9 = vld [vmem:[%s2742_s5 + $0xf0] sm:$0xff] }
 0x25c   : > { %1966 = vmatpush1.bf16.msra.mxu1 %v1965_v14  ;;  %2042 = vmatpush1.bf16.msra.mxu0 %v2456_v16  ;;  %v1973_v41 = vpack.c.bf16 %v1723_v34, %v1721_v9  ;;  %v1989_v14 = vpack.c.bf16 %v685_v12, %v683_v11  ;;  %v1762_v9 = vld [vmem:[%s2742_s5 + $0x1f8] sm:$0xff]  ;;  %v1764_v34 = vld [vmem:[%s2742_s5 + $0x208] sm:$0xff] }
 0x25d   : > { %1349 = vmatprep.mubr.f32.mxu0 %v2198_v0  ;;  %1968 = vmatprep.subr.bf16.mxu1 %v1967_v22  ;;  %v1760_v22 = vld [vmem:[%s2742_s5 + $0x1e8] sm:$0xff]  ;;  %v2031_v37 = vpack.c.bf16 %v1764_v34, %v1762_v9 }
 0x25e   : > { %2044 = vmatprep.subr.bf16.mxu0 %v2467_v23  ;;  %967 = vmatprep.mubr.f32.mxu1 %v2198_v0  ;;  %v2027_v30 = vpack.c.bf16 %v1760_v22, %v1758_v20 }
 0x25f   : > { %1752 = vmatmul.mubr.msk.f32.gmra.mrb[4].mxu0 %vm366_vm6, %v2392_v26  ;;  %v1726_v26 = vld [vmem:[%s2742_s5 + $0x118] sm:$0xff] }
 0x260   : > { %1970 = vmatpush1.bf16.msra.mxu1 %v1969_v31  ;;  %1530 = vmatprep.mubr.f32.mxu0 %v2198_v0  ;;  %v1757_v31 = vld [vmem:[%s2742_s5 + $0x1d0] sm:$0xff] }
 0x261   : > { %2046 = vmatpush1.bf16.msra.mxu0 %v2487_v32  ;;  %1972 = vmatprep.subr.bf16.mxu1 %v1971_v33  ;;  %v1759_v33 = vld [vmem:[%s2742_s5 + $0x1e0] sm:$0xff] }
 0x262   : > { %2048 = vmatprep.subr.bf16.mxu0 %v2496_v35  ;;  %v2029_v36 = vpack.c.bf16 %v1759_v33, %v1757_v31  ;;  %v1543_v33 = vld [vmem:[%s2741_s4] sm:$0x3] }
 0x264   : > { %1974 = vmatpush1.bf16.msra.mxu1 %v1973_v41  ;;  %v1766_v41 = vld [vmem:[%s2742_s5 + $0x218] sm:$0xff] }
 0x265   : > { %2050 = vmatpush1.bf16.msra.mxu0 %v2515_v42  ;;  %919 = vmatprep.subr.mxu1 %v1726_v26  ;;  %v2033_v26 = vpack.c.bf16 %v1763_v39, %v1761_v38 }
 0x266   : > { %2052 = vmatprep.subr.bf16.mxu0 %v2521_v44 }
 0x268   : > { %920 = vmatpush1.msra.mxu1 %v1725_v52 }
 0x269   : > { %2054 = vmatpush1.bf16.msra.mxu0 %v2545_v53  ;;  %1727 = vmatmul.mubr.msk.f32.vlgmr.msra.gmra.mrb[4].mxu1 %vm366_vm6, %v2355_v21 }
 0x26a   : > { %1976 = vmatprep.subr.bf16.mxu1 %v1975_v56  ;;  %1482 = vmatprep.subr.mxu0 %v2557_v58 }
 0x26b   : > { %1978 = vmatpush1.bf16.msra.mxu1 %v1977_v57  ;;  %973 = vmatprep.mubr.f32.mxu1 %v2198_v0  ;;  %v1091_v57 = vld [vmem:[%s2743_s6] sm:$0x3] }
 0x26c   : > { %1980 = vmatprep.subr.bf16.mxu1 %v1979_v59 }
 0x26d   : > { %1483 = vmatpush1.msra.mxu0 %v2578_v1  ;;  %1728 = vmatmul.mubr.msk.f32.gmra.mrb[6].mxu1 %vm366_vm6, %v2359_v25 }
 0x26e   : > { %1773 = vmatmul.mubr.msk.f32.vlgmr.msra.gmra.mrb[6].mxu0 %vm366_vm6, %v2355_v21  ;;  %1050 = vmatprep.mubr.f32.mxu1 %v2198_v0  ;;  %v688_v21 = vld [vmem:[%s2742_s5 + $0x88] sm:$0xff] }
 0x26f   : > { %1982 = vmatpush1.bf16.msra.mxu1 %v1981_v2 }
 0x270   : > { %1984 = vmatprep.subr.bf16.mxu1 %v1983_v3 }
 0x273   : > { %1986 = vmatpush1.bf16.msra.mxu1 %v1985_v8 }
 0x274   : > { %1988 = vmatprep.subr.bf16.mxu1 %v1987_v10 }
 0x277   : > { %1990 = vmatpush1.bf16.msra.mxu1 %v1989_v14 }
 0x278   : > { %1002 = vmatprep.subr.mxu1 %v688_v21 }
 0x27b   : > { %1003 = vmatpush1.msra.mxu1 %v687_v24 }
 0x27c   : > { %1729 = vmatmul.mubr.msk.f32.vlgmr.msra.gmra.mrb[4].mxu1 %vm366_vm6, %v2363_v28  ;;  %2024 = vmatprep.subr.bf16.mxu1 %v2023_v27  ;;  %v1768_v28 = vld [vmem:[%s2742_s5 + $0x228] sm:$0xff] }
 0x27d   : > { %2026 = vmatpush1.bf16.msra.mxu1 %v2025_v29  ;;  %1056 = vmatprep.mubr.f32.mxu1 %v2198_v0  ;;  %v2035_v45 = vpack.c.bf16 %v1768_v28, %v1766_v41  ;;  %v1571_v41 = vld [vmem:[%s2743_s6] sm:$0x3] }
 0x27e   : > { %2028 = vmatprep.subr.bf16.mxu1 %v2027_v30 }
 0x280   : > { %1730 = vmatmul.mubr.msk.f32.gmra.mrb[6].mxu1 %vm366_vm6, %v2367_v40  ;;  %v1770_v40 = vld [vmem:[%s2742_s5 + $0x238] sm:$0xff] }
 0x281   : > { %2030 = vmatpush1.bf16.msra.mxu1 %v2029_v36  ;;  %1447 = vmatprep.mubr.f32.mxu1 %v2198_v0 }
 0x282   : > { %2032 = vmatprep.subr.bf16.mxu1 %v2031_v37 }
 0x285   : > { %2034 = vmatpush1.bf16.msra.mxu1 %v2033_v26 }
 0x286   : > { %2036 = vmatprep.subr.bf16.mxu1 %v2035_v45 }
 0x289   : > { %2038 = vmatpush1.bf16.msra.mxu1 %v2037_v48 }
 0x28a   : > { %1399 = vmatprep.subr.mxu1 %v1770_v40 }
 0x28d   : > { %1400 = vmatpush1.msra.mxu1 %v1769_v50 }
 0x28e   : > { %1771 = vmatmul.mubr.msk.f32.vlgmr.msra.gmra.mrb[8].mxu1 %vm366_vm6, %v2371_v43  ;;  %2055 = vmatprep.subr.bf16.mxu1 %v2450_v13 }
 0x28f   : > { %2060 = vmatpush1.bf16.msra.mxu1 %v2456_v16  ;;  %1453 = vmatprep.mubr.f32.mxu1 %v2198_v0 }
 0x290   : > { %2056 = vmatprep.subr.bf16.mxu1 %v2467_v23 }
 0x292   : > { %1772 = vmatmul.mubr.msk.f32.gmra.mrb[10].mxu1 %vm366_vm6, %v2375_v49 }
 0x293   : > { %2061 = vmatpush1.bf16.msra.mxu1 %v2487_v32  ;;  %1536 = vmatprep.mubr.f32.mxu1 %v2198_v0 }
 0x294   : > { %2057 = vmatprep.subr.bf16.mxu1 %v2496_v35 }
 0x297   : > { %2062 = vmatpush1.bf16.msra.mxu1 %v2515_v42  ;;  %v1065_v42 = vlaneseq }
 0x298   : > { %2058 = vmatprep.subr.bf16.mxu1 %v2521_v44 }
 0x299   : > { %v1066_v44 = vshrl.u32 %v1065_v42, 7 }
 0x29b   : > { %2063 = vmatpush1.bf16.msra.mxu1 %v2545_v53  ;;  %v1067_v53 = vsub.s32 0, %v1066_v44 }
 0x29c   : > { %2059 = vmatprep.subr.mxu1 %v2557_v58 }
 0x29d   : > { %v1068_v55 = vrot.slane %v1063_v54, %v1067_v53  ;;  %v1096_v60 = vrot.slane %v1091_v57, %v1067_v53  ;;  %v1548_v38 = vrot.slane %v1543_v33, %v1067_v53  ;;  %v1576_v26 = vrot.slane %v1571_v41, %v1067_v53 }
 0x29f   : > { %2064 = vmatpush1.msra.mxu1 %v2578_v1 }
 0x2a0   : > { %1774 = vmatmul.mubr.msk.f32.vlgmr.msra.gmra.mrb[10].mxu1 %vm366_vm6, %v2359_v25  ;;  %v1071_v25 = vsub.s32 1, %v1066_v44 }
 0x2a2   : > { %v1072_v56 = vrot.slane %v1063_v54, %v1071_v25  ;;  %v1100_v61 = vrot.slane %v1091_v57, %v1071_v25  ;;  %v1552_v39 = vrot.slane %v1543_v33, %v1071_v25  ;;  %v1580_v47 = vrot.slane %v1571_v41, %v1071_v25 }
 0x329   : > { %v865_v43 = vpop.f32.mrb[0].mxu1 }
 0x32a   : > { %v867_v49 = vpop.f32.mrb[1].mxu1  ;;  %v1075_v58 = vadd.f32 %v1068_v55, %v865_v43 }
 0x32b   : > { %v1076_v59 = vadd.f32 %v1072_v56, %v867_v49 }
 0x32c   : > { %v1083_v62 = vmul.f32 0.05, %v1075_v58  ;;  %vm1079_vm9 = vcmp.ge.f32.partialorder %v1075_v58, 0.0 }
 0x32d   : > { %v871_v13 = vpop.f32.mrb[2].mxu1  ;;  %v1084_v63 = vmul.f32 0.05, %v1076_v59  ;;  %vm1080_vm10 = vcmp.ge.f32.partialorder %v1076_v59, 0.0 }
 0x32e   : > { %v2689_v16 = vpop.f32.mrb[2].mxu0  ;;  %v873_v0 = vpop.f32.mrb[3].mxu1  ;;  %v1077_v2 = vadd.f32 %v1068_v55, %v871_v13  ;;  %v1087_v8 = vsel %vm1079_vm9, %v1075_v58, %v1083_v62 }
 0x32f   : > { %v2691_v23 = vpop.f32.mrb[3].mxu0  ;;  %v1078_v5 = vadd.f32 %v1072_v56, %v873_v0  ;;  %v1088_v10 = vsel %vm1080_vm10, %v1076_v59, %v1084_v63  ;;  %v1555_v28 = vadd.f32 %v1548_v38, %v2689_v16 }
 0x330   : > { %vm1081_vm13 = vcmp.ge.f32.partialorder %v1077_v2, 0.0  ;;  %v1085_v14 = vmul.f32 0.05, %v1077_v2  ;;  %v1556_v45 = vadd.f32 %v1552_v39, %v2691_v23 }
 0x331   : > { %v1086_v18 = vmul.f32 0.05, %v1078_v5  ;;  %vm1082_vm14 = vcmp.ge.f32.partialorder %v1078_v5, 0.0  ;;  %v1563_v43 = vmul.f32 0.05, %v1555_v28  ;;  %vm1559_vm1 = vcmp.ge.f32.partialorder %v1555_v28, 0.0 }
 0x332   : > { %v2693_v32 = vpop.f32.mrb[4].mxu0  ;;  %v1089_v30 = vsel %vm1081_vm13, %v1077_v2, %v1085_v14  ;;  %v1564_v13 = vmul.f32 0.05, %v1556_v45  ;;  %vm1560_vm2 = vcmp.ge.f32.partialorder %v1556_v45, 0.0 }
 0x333   : > { %v2695_v35 = vpop.f32.mrb[5].mxu0  ;;  %v1090_v9 = vsel %vm1082_vm14, %v1078_v5, %v1086_v18  ;;  %v1567_v23 = vsel %vm1559_vm1, %v1555_v28, %v1563_v43 }
 0x334   : > { %v1568_v53 = vsel %vm1560_vm2, %v1556_v45, %v1564_v13  ;;  %v1558_v55 = vadd.f32 %v1552_v39, %v2695_v35 }
 0x336   : > { %vm1562_vm6 = vcmp.ge.f32.partialorder %v1558_v55, 0.0 }
 0x341   : > { %v2697_v51 = vpop.f32.mrb[6].mxu0 }
 0x342   : > { %v2699_v52 = vpop.f32.mrb[7].mxu0 }
 0x34f   : > { %v1052_v1 = vpop.f32.mrb[4].mxu1 }
 0x350   : > { %v1103_v3 = vadd.f32 %v1096_v60, %v1052_v1  ;;  %v1054_v4 = vpop.f32.mrb[5].mxu1 }
 0x351   : > { %v1104_v6 = vadd.f32 %v1100_v61, %v1054_v4 }
 0x352   : > { %vm1107_vm11 = vcmp.ge.f32.partialorder %v1103_v3, 0.0  ;;  %v1111_v7 = vmul.f32 0.05, %v1103_v3 }
 0x353   : > { %vm1108_vm12 = vcmp.ge.f32.partialorder %v1104_v6, 0.0  ;;  %v1112_v11 = vmul.f32 0.05, %v1104_v6  ;;  %v1058_v12 = vpop.f32.mrb[6].mxu1 }
 0x354   : > { %v1115_v21 = vsel %vm1107_vm11, %v1103_v3, %v1111_v7  ;;  %v1105_v15 = vadd.f32 %v1096_v60, %v1058_v12  ;;  %v1060_v17 = vpop.f32.mrb[7].mxu1  ;;  %v1566_v60 = vmul.f32 0.05, %v1558_v55 }
 0x355   : > { %v1119_v19 = vadd.f32 %v1115_v21, %v1087_v8  ;;  %v1116_v20 = vsel %vm1108_vm12, %v1104_v6, %v1112_v11  ;;  %v1106_v22 = vadd.f32 %v1100_v61, %v1060_v17 }
 0x356   : > { %v1120_v24 = vadd.f32 %v1116_v20, %v1088_v10  ;;  %vm1109_vm15 = vcmp.ge.f32.partialorder %v1105_v15, 0.0  ;;  %v1113_v27 = vmul.f32 0.05, %v1105_v15  ;;  %v1570_v3 = vsel %vm1562_vm6, %v1558_v55, %v1566_v60 }
 0x357   : > { %1123 = vst [vmem:[%s2711_s23] sm:$0xff] %v1119_v19  ;;  %vm1110_vm0 = vcmp.ge.f32.partialorder %v1106_v22, 0.0  ;;  %v1114_v29 = vmul.f32 0.05, %v1106_v22 }
 0x358   : > { %1124 = vst [vmem:[%s2711_s23 + $0x8] sm:$0xff] %v1120_v24  ;;  %v1117_v31 = vsel %vm1109_vm15, %v1105_v15, %v1113_v27 }
 0x359   : > { %v1121_v34 = vadd.f32 %v1117_v31, %v1089_v30  ;;  %v1118_v36 = vsel %vm1110_vm0, %v1106_v22, %v1114_v29 }
 0x35a   : > { %v1122_v37 = vadd.f32 %v1118_v36, %v1090_v9 }
 0x35b   : > { %1125 = vst [vmem:[%s2711_s23 + $0x10] sm:$0xff] %v1121_v34 }
 0x35c   : > { %1126 = vst [vmem:[%s2711_s23 + $0x18] sm:$0xff] %v1122_v37 }
 0x361   : > { %v1449_v46 = vpop.f32.mrb[8].mxu1 }
 0x362   : > { %v1533_v48 = vadd.f32 %v2697_v51, %v1449_v46  ;;  %v1451_v40 = vpop.f32.mrb[9].mxu1 }
 0x363   : > { %v1535_v50 = vadd.f32 %v2699_v52, %v1451_v40  ;;  %v1557_v52 = vadd.f32 %v1548_v38, %v2693_v32 }
 0x364   : > { %v1583_v49 = vadd.f32 %v1576_v26, %v1533_v48 }
 0x365   : > { %v1584_v0 = vadd.f32 %v1580_v47, %v1535_v50  ;;  %v1565_v57 = vmul.f32 0.05, %v1557_v52  ;;  %vm1561_vm5 = vcmp.ge.f32.partialorder %v1557_v52, 0.0 }
 0x366   : > { %vm1587_vm3 = vcmp.ge.f32.partialorder %v1583_v49, 0.0  ;;  %v1591_v16 = vmul.f32 0.05, %v1583_v49 }
 0x367   : > { %vm1588_vm4 = vcmp.ge.f32.partialorder %v1584_v0, 0.0  ;;  %v1592_v42 = vmul.f32 0.05, %v1584_v0  ;;  %v1569_v1 = vsel %vm1561_vm5, %v1557_v52, %v1565_v57 }
 0x368   : > { %v1595_v44 = vsel %vm1587_vm3, %v1583_v49, %v1591_v16 }
 0x369   : > { %v1599_v25 = vadd.f32 %v1595_v44, %v1567_v23  ;;  %v1596_v51 = vsel %vm1588_vm4, %v1584_v0, %v1592_v42 }
 0x36a   : > { %v1600_v54 = vadd.f32 %v1596_v51, %v1568_v53 }
 0x36b   : > { %1775 = vst [vmem:[%s2711_s23 + $0x20] sm:$0xff] %v1599_v25 }
 0x36c   : > { %1776 = vst [vmem:[%s2711_s23 + $0x28] sm:$0xff] %v1600_v54 }
 0x373   : > { %v1538_v56 = vpop.f32.mrb[10].mxu1 }
 0x374   : > { %v1585_v58 = vadd.f32 %v1576_v26, %v1538_v56  ;;  %v1540_v59 = vpop.f32.mrb[11].mxu1 }
 0x375   : > { %v1586_v61 = vadd.f32 %v1580_v47, %v1540_v59 }
 0x376   : > { %vm1589_vm7 = vcmp.ge.f32.partialorder %v1585_v58, 0.0  ;;  %v1593_v62 = vmul.f32 0.05, %v1585_v58 }
 0x377   : > { %vm1590_vm8 = vcmp.ge.f32.partialorder %v1586_v61, 0.0  ;;  %v1594_v63 = vmul.f32 0.05, %v1586_v61 }
 0x378   : > { %v1597_v2 = vsel %vm1589_vm7, %v1585_v58, %v1593_v62 }
 0x379   : > { %v1601_v32 = vadd.f32 %v1597_v2, %v1569_v1  ;;  %v1598_v4 = vsel %vm1590_vm8, %v1586_v61, %v1594_v63 }
 0x37a   : > { %v1602_v35 = vadd.f32 %v1598_v4, %v1570_v3 }
 0x37b   : > { %1777 = vst [vmem:[%s2711_s23 + $0x30] sm:$0xff] %v1601_v32 }
 0x37c   : > { %1778 = vst [vmem:[%s2711_s23 + $0x38] sm:$0xff] %v1602_v35 }
 0x37d PF: > { %s19_s24 = sadd.s32 1, %s2190_s24  }
 0x37e   : > { %p16_p5 = scmp.ge.s32.totalorder %s19_s24, 4  }
 0x380   :  { %18 = sbr.rel (!%p16_p5) target bundleno = 2 (0x2), region = 96 }
 0x387   :  { %1629 = vsyncpa [#allocation5], 1 }
 0x388   :  { %1631 = vsyncpa [#allocation5 + $0x1], 1 }
 0x389   :  { %1632 = vsyncpa [#allocation7], 1 }

</bundles_post_ra>
